<compile_context>
chip_gen: v5e
topology: v5e:2x2
jax: 0.10.0
libtpu: 0.0.40
codegen_flags: <defaults>
</compile_context>

<pallas_src>
import jax
import jax.numpy as jnp
import numpy as np
from jax.experimental import pallas as pl
from jax.experimental.pallas import tpu as pltpu

EPS = 1e-5


# ------------------------------ fused kernel -------------------------------- #

def dqn_forward(x_nchw, kp):
    """x_nchw: (B, 1, H, W) float; kp: packed kernel params from pack_params."""
    B, _, H, W = x_nchw.shape
    N = B * H * W
    n_out = kp["bh"].shape[0]
    shifts = (0, 1, W, W + 1)                      # 2x2 taps on the canvas
    inv_counts = tuple(1.0 / (B * (H - 1 - l) * (W - 1 - l)) for l in range(3))

    def kernel(x_ref, w1_ref, gb1_ref, w2_ref, gb2_ref, w3_ref, gb3_ref,
               masks_ref, ws_ref, bh_ref, ind_ref, gsel_ref, o_ref):
        f32 = jnp.float32

        def taps(a):
            # the four 2x2-conv taps are pure column rotations of the canvas;
            # wraparound only ever lands in masked / zero-weighted columns.
            return [a if s == 0 else pltpu.roll(a, N - s, 1) for s in shifts]

        def bn_relu(y, gb_ref, mask, inv_count):
            # training-mode BatchNorm2d over valid positions only, one pass
            # (sum & sum-of-squares), biased variance, folded scale/shift FMA.
            ym = y * mask                                  # (C, N)
            mean = jnp.sum(ym, axis=1, keepdims=True) * inv_count     # (C, 1)
            ex2 = jnp.sum(ym * y, axis=1, keepdims=True) * inv_count
            var = ex2 - mean * mean
            scale = gb_ref[0] * jax.lax.rsqrt(var + EPS)   # gamma * rsqrt (EUP)
            shift = gb_ref[1] - mean * scale               # beta  - mean*scale
            return jnp.maximum(y * scale + shift, 0.0)

        # ---- layer 1 (Cin=1): 4 VPU outer-product taps, no MXU ----
        x = x_ref[...]                                     # (1, N)
        xt = taps(x)
        y1 = w1_ref[0] * xt[0]                             # (c1,1)*(1,N)
        for k in range(1, 4):
            y1 = y1 + w1_ref[k] * xt[k]                    # (c1, N)
        a1 = bn_relu(y1, gb1_ref, masks_ref[0], inv_counts[0])

        # ---- layer 2: in-VMEM im2col (sublane concat of rolled taps) + MXU ----
        p2 = jnp.concatenate(taps(a1), axis=0)             # (4*c1, N)
        y2 = jnp.dot(w2_ref[...], p2, preferred_element_type=f32)   # (c2, N)
        a2 = bn_relu(y2, gb2_ref, masks_ref[1], inv_counts[1])

        # ---- layer 3 ----
        p3 = jnp.concatenate(taps(a2), axis=0)             # (4*c2, N)
        y3 = jnp.dot(w3_ref[...], p3, preferred_element_type=f32)   # (c3, N)
        a3 = bn_relu(y3, gb3_ref, masks_ref[2], inv_counts[2])

        # ---- linear head: weights already in canvas order, zero-padded,
        #      batch-tiled; contract (channel, position) via elementwise
        #      product + two small selector matmuls.
        prod = ws_ref[...] * jnp.tile(a3, (n_out, 1))      # (n_out*c3, N)
        r = jnp.dot(prod, ind_ref[...],
                    preferred_element_type=f32)            # (n_out*c3, B)
        o_ref[...] = jnp.dot(gsel_ref[...], r,
                             preferred_element_type=f32) + bh_ref[...]  # (n_out,B)

    out_t = pl.pallas_call(
        kernel,
        out_shape=jax.ShapeDtypeStruct((n_out, B), jnp.float32),
        in_specs=[pl.BlockSpec(memory_space=pltpu.MemorySpace.VMEM)] * 12,
        out_specs=pl.BlockSpec(memory_space=pltpu.MemorySpace.VMEM),
    )(x_nchw.astype(jnp.float32).reshape(1, N),
      kp["w1"], kp["gb1"], kp["w2"], kp["gb2"], kp["w3"], kp["gb3"],
      kp["masks"], kp["ws"], kp["bh"], kp["ind"], kp["gsel"])
    # (n_out, B) -> (B, n_out); 32-byte transpose, negligible.
    return out_t.T
    # TODO(synk): for large B, add a grid over canvas column tiles
    # (dimension_semantics=("parallel",)) with two-pass BN partials so v7x's
    # 64 MiB VMEM / 2 TensorCores are used; unnecessary at these sizes.


# ---------------------------- parameter packing ----------------------------- #

def conv2d_size_out(size, kernel_size=2, stride=1):
    return (size - (kernel_size - 1) - 1) // stride + 1


def init_params(key, h, w, outputs):
    """PyTorch-equivalent parameters (HWIO conv weights, BN affine, head)."""
    convw = conv2d_size_out(conv2d_size_out(conv2d_size_out(w)))
    convh = conv2d_size_out(conv2d_size_out(conv2d_size_out(h)))
    lin_in = convw * convh * 32

    keys = jax.random.split(key, 8)

    def conv_w(k, cin, cout):
        bound = 1.0 / np.sqrt(cin * 2 * 2)
        return jax.random.uniform(k, (2, 2, cin, cout), jnp.float32, -bound, bound)

    def conv_b(k, cin, cout):
        bound = 1.0 / np.sqrt(cin * 2 * 2)
        return jax.random.uniform(k, (cout,), jnp.float32, -bound, bound)

    hb = 1.0 / np.sqrt(lin_in)
    return {
        "w1": conv_w(keys[0], 1, 16),  "b1": conv_b(keys[1], 1, 16),
        "w2": conv_w(keys[2], 16, 32), "b2": conv_b(keys[3], 16, 32),
        "w3": conv_w(keys[4], 32, 32), "b3": conv_b(keys[5], 32, 32),
        "g1": jnp.ones((16,), jnp.float32), "be1": jnp.zeros((16,), jnp.float32),
        "g2": jnp.ones((32,), jnp.float32), "be2": jnp.zeros((32,), jnp.float32),
        "g3": jnp.ones((32,), jnp.float32), "be3": jnp.zeros((32,), jnp.float32),
        "wh": jax.random.uniform(keys[6], (outputs, lin_in), jnp.float32, -hb, hb),
        "bh": jax.random.uniform(keys[7], (outputs,), jnp.float32, -hb, hb),
    }


def pack_params(params, B, H, W):
    """One-time repack of PyTorch-style params into kernel layouts."""
    HW = H * W
    N = B * HW

    def conv_pack(w_hwio):
        kh, kw, cin, cout = w_hwio.shape
        w = w_hwio.reshape(kh * kw, cin, cout)             # tap k = kh*2 + kw
        return jnp.transpose(w, (2, 0, 1)).reshape(cout, kh * kw * cin)

    def gb_pack(g, be):
        return jnp.stack([g, be], axis=0)[:, :, None]      # (2, C, 1)

    c1 = params["w1"].shape[3]
    c3 = params["w3"].shape[3]
    n_out, lin_in = params["wh"].shape
    convh, convw = H - 3, W - 3
    assert lin_in == c3 * convh * convw

    # layer-1 taps as (4, c1, 1): kernel indexes the leading dim only.
    w1k = params["w1"].reshape(4, c1)[:, :, None]

    # conv biases are dropped (cancel exactly in training-mode BN).

    # head weight: NCHW-flat -> (o, c, i, j) -> zero-pad to the H x W canvas
    # -> (n_out*c3, HW) -> tile across batch blocks.
    ws = params["wh"].reshape(n_out, c3, convh, convw)
    ws = jnp.pad(ws, ((0, 0), (0, 0), (0, H - convh), (0, W - convw)))
    ws = ws.reshape(n_out * c3, HW)
    ws = jnp.tile(ws, (1, B))                              # (n_out*c3, N)

    ii = (jnp.arange(HW, dtype=jnp.int32) // W) % H
    jj = jnp.arange(HW, dtype=jnp.int32) % W

    def valid_mask(h_out, w_out):
        m = ((ii < h_out) & (jj < w_out)).astype(jnp.float32)
        return jnp.tile(m, (B,)).reshape(1, N)

    masks = jnp.stack([valid_mask(H - 1, W - 1),
                       valid_mask(H - 2, W - 2),
                       valid_mask(H - 3, W - 3)], axis=0)  # (3, 1, N)

    # 0/1 selectors for the head: batch-block column sums, channel-group sums.
    ind = (jnp.arange(N)[:, None] // HW
           == jnp.arange(B)[None, :]).astype(jnp.float32)          # (N, B)
    gsel = (jnp.arange(n_out * c3)[None, :] // c3
            == jnp.arange(n_out)[:, None]).astype(jnp.float32)     # (n_out, n_out*c3)

    return {
        "w1": w1k, "gb1": gb_pack(params["g1"], params["be1"]),
        "w2": conv_pack(params["w2"]), "gb2": gb_pack(params["g2"], params["be2"]),
        "w3": conv_pack(params["w3"]), "gb3": gb_pack(params["g3"], params["be3"]),
        "masks": masks, "ws": ws, "bh": params["bh"][:, None],
        "ind": ind, "gsel": gsel,
    }


# ----------------------------- pure-JAX reference --------------------------- #

def dqn_reference(x_nchw, params):
    def conv(x, w_hwio, b):
        w_oihw = jnp.transpose(w_hwio, (3, 2, 0, 1))
        y = jax.lax.conv_general_dilated(
            x, w_oihw, (1, 1), "VALID",
            dimension_numbers=("NCHW", "OIHW", "NCHW"),
            precision=jax.lax.Precision.HIGHEST)
        return y + b[None, :, None, None]

    def bn_relu(x, g, be):
        mean = jnp.mean(x, axis=(0, 2, 3), keepdims=True)
        var = jnp.mean(jnp.square(x - mean), axis=(0, 2, 3), keepdims=True)
        y = (x - mean) * jax.lax.rsqrt(var + EPS)
        y = y * g[None, :, None, None] + be[None, :, None, None]
        return jnp.maximum(y, 0.0)

    x = bn_relu(conv(x_nchw, params["w1"], params["b1"]), params["g1"], params["be1"])
    x = bn_relu(conv(x, params["w2"], params["b2"]), params["g2"], params["be2"])
    x = bn_relu(conv(x, params["w3"], params["b3"]), params["g3"], params["be3"])
    flat = x.reshape(x.shape[0], -1)
    return jnp.dot(flat, params["wh"].T,
                   precision=jax.lax.Precision.HIGHEST) + params["bh"]


# ---------------------------------- main ------------------------------------ #

if __name__ == "__main__":
    B, H, W, OUTPUTS = 2, 16, 16, 4
    key = jax.random.PRNGKey(0)
    k_x, k_p = jax.random.split(key)
    x = jax.random.normal(k_x, (B, 1, H, W), jnp.float32)   # NCHW like PyTorch
    params = init_params(k_p, H, W, OUTPUTS)
    packed = pack_params(params, B, H, W)                   # one-time repack

    out = jax.block_until_ready(dqn_forward(x, packed))
    ref = jax.block_until_ready(dqn_reference(x, params))

    if out.shape != (B, OUTPUTS):
        raise AssertionError(f"bad output shape {out.shape}")
    if not np.allclose(np.asarray(out), np.asarray(ref), rtol=5e-2, atol=5e-2):
        raise AssertionError(
            f"mismatch vs reference: max abs diff "
            f"{np.max(np.abs(np.asarray(out) - np.asarray(ref)))}")
    print("KERNEL_OK")
</pallas_src>

<mosaic_0001>
module attributes {stable_mosaic.version = 11 : i64} {
  func.func @kernel(%arg0: memref<1x512xf32, #tpu.memory_space<vmem>>, %arg1: memref<4x16x1xf32, #tpu.memory_space<vmem>>, %arg2: memref<2x16x1xf32, #tpu.memory_space<vmem>>, %arg3: memref<32x64xf32, #tpu.memory_space<vmem>>, %arg4: memref<2x32x1xf32, #tpu.memory_space<vmem>>, %arg5: memref<32x128xf32, #tpu.memory_space<vmem>>, %arg6: memref<2x32x1xf32, #tpu.memory_space<vmem>>, %arg7: memref<3x1x512xf32, #tpu.memory_space<vmem>>, %arg8: memref<128x512xf32, #tpu.memory_space<vmem>>, %arg9: memref<4x1xf32, #tpu.memory_space<vmem>>, %arg10: memref<512x2xf32, #tpu.memory_space<vmem>>, %arg11: memref<4x128xf32, #tpu.memory_space<vmem>>, %arg12: memref<4x2xf32, #tpu.memory_space<vmem>>) attributes {dimension_semantics = [], scalar_prefetch = 0 : i64, scratch_operands = 0 : i64, tpu.core_type = #tpu.core_type<tc>} {
    %c0 = arith.constant 0 : index
    %c0_0 = arith.constant 0 : index
    %0 = vector.load %arg0[%c0, %c0_0] : memref<1x512xf32, #tpu.memory_space<vmem>>, vector<1x512xf32>
    %c511_i32 = arith.constant 511 : i32
    %1 = tpu.dynamic_rotate %0 by %c511_i32 dim 1 : vector<1x512xf32>, i32 -> vector<1x512xf32>
    %c496_i32 = arith.constant 496 : i32
    %2 = tpu.dynamic_rotate %0 by %c496_i32 dim 1 : vector<1x512xf32>, i32 -> vector<1x512xf32>
    %c495_i32 = arith.constant 495 : i32
    %3 = tpu.dynamic_rotate %0 by %c495_i32 dim 1 : vector<1x512xf32>, i32 -> vector<1x512xf32>
    %c0_1 = arith.constant 0 : index
    %c0_2 = arith.constant 0 : index
    %c0_3 = arith.constant 0 : index
    %4 = vector.load %arg1[%c0_1, %c0_2, %c0_3] : memref<4x16x1xf32, #tpu.memory_space<vmem>>, vector<1x16x1xf32>
    %5 = vector.shape_cast %4 : vector<1x16x1xf32> to vector<16x1xf32>
    %6 = vector.broadcast %5 : vector<16x1xf32> to vector<16x512xf32>
    %7 = vector.broadcast %0 : vector<1x512xf32> to vector<16x512xf32>
    %8 = arith.mulf %6, %7 : vector<16x512xf32>
    %c1 = arith.constant 1 : index
    %c0_4 = arith.constant 0 : index
    %c0_5 = arith.constant 0 : index
    %9 = vector.load %arg1[%c1, %c0_4, %c0_5] : memref<4x16x1xf32, #tpu.memory_space<vmem>>, vector<1x16x1xf32>
    %10 = vector.shape_cast %9 : vector<1x16x1xf32> to vector<16x1xf32>
    %11 = vector.broadcast %10 : vector<16x1xf32> to vector<16x512xf32>
    %12 = vector.broadcast %1 : vector<1x512xf32> to vector<16x512xf32>
    %13 = arith.mulf %11, %12 : vector<16x512xf32>
    %14 = arith.addf %8, %13 : vector<16x512xf32>
    %c2 = arith.constant 2 : index
    %c0_6 = arith.constant 0 : index
    %c0_7 = arith.constant 0 : index
    %15 = vector.load %arg1[%c2, %c0_6, %c0_7] : memref<4x16x1xf32, #tpu.memory_space<vmem>>, vector<1x16x1xf32>
    %16 = vector.shape_cast %15 : vector<1x16x1xf32> to vector<16x1xf32>
    %17 = vector.broadcast %16 : vector<16x1xf32> to vector<16x512xf32>
    %18 = vector.broadcast %2 : vector<1x512xf32> to vector<16x512xf32>
    %19 = arith.mulf %17, %18 : vector<16x512xf32>
    %20 = arith.addf %14, %19 : vector<16x512xf32>
    %c3 = arith.constant 3 : index
    %c0_8 = arith.constant 0 : index
    %c0_9 = arith.constant 0 : index
    %21 = vector.load %arg1[%c3, %c0_8, %c0_9] : memref<4x16x1xf32, #tpu.memory_space<vmem>>, vector<1x16x1xf32>
    %22 = vector.shape_cast %21 : vector<1x16x1xf32> to vector<16x1xf32>
    %23 = vector.broadcast %22 : vector<16x1xf32> to vector<16x512xf32>
    %24 = vector.broadcast %3 : vector<1x512xf32> to vector<16x512xf32>
    %25 = arith.mulf %23, %24 : vector<16x512xf32>
    %26 = arith.addf %20, %25 : vector<16x512xf32>
    %c0_10 = arith.constant 0 : index
    %c0_11 = arith.constant 0 : index
    %c0_12 = arith.constant 0 : index
    %27 = vector.load %arg7[%c0_10, %c0_11, %c0_12] : memref<3x1x512xf32, #tpu.memory_space<vmem>>, vector<1x1x512xf32>
    %28 = vector.shape_cast %27 : vector<1x1x512xf32> to vector<1x512xf32>
    %29 = vector.broadcast %28 : vector<1x512xf32> to vector<16x512xf32>
    %30 = arith.mulf %26, %29 : vector<16x512xf32>
    %cst = arith.constant dense<0.000000e+00> : vector<16xf32>
    %31 = vector.multi_reduction <add>, %30, %cst [1] : vector<16x512xf32> to vector<16xf32>
    %32 = vector.shape_cast %31 : vector<16xf32> to vector<16x1xf32>
    %cst_13 = arith.constant 0.00222222228 : f32
    %33 = vector.broadcast %cst_13 : f32 to vector<16x1xf32>
    %34 = arith.mulf %32, %33 : vector<16x1xf32>
    %35 = arith.mulf %30, %26 : vector<16x512xf32>
    %cst_14 = arith.constant dense<0.000000e+00> : vector<16xf32>
    %36 = vector.multi_reduction <add>, %35, %cst_14 [1] : vector<16x512xf32> to vector<16xf32>
    %37 = vector.shape_cast %36 : vector<16xf32> to vector<16x1xf32>
    %cst_15 = arith.constant 0.00222222228 : f32
    %38 = vector.broadcast %cst_15 : f32 to vector<16x1xf32>
    %39 = arith.mulf %37, %38 : vector<16x1xf32>
    %40 = arith.mulf %34, %34 : vector<16x1xf32>
    %41 = arith.subf %39, %40 : vector<16x1xf32>
    %c0_16 = arith.constant 0 : index
    %c0_17 = arith.constant 0 : index
    %c0_18 = arith.constant 0 : index
    %42 = vector.load %arg2[%c0_16, %c0_17, %c0_18] : memref<2x16x1xf32, #tpu.memory_space<vmem>>, vector<1x16x1xf32>
    %43 = vector.shape_cast %42 : vector<1x16x1xf32> to vector<16x1xf32>
    %cst_19 = arith.constant 9.99999974E-6 : f32
    %44 = vector.broadcast %cst_19 : f32 to vector<16x1xf32>
    %45 = arith.addf %41, %44 : vector<16x1xf32>
    %46 = math.rsqrt %45 : vector<16x1xf32>
    %47 = arith.mulf %43, %46 : vector<16x1xf32>
    %c1_20 = arith.constant 1 : index
    %c0_21 = arith.constant 0 : index
    %c0_22 = arith.constant 0 : index
    %48 = vector.load %arg2[%c1_20, %c0_21, %c0_22] : memref<2x16x1xf32, #tpu.memory_space<vmem>>, vector<1x16x1xf32>
    %49 = vector.shape_cast %48 : vector<1x16x1xf32> to vector<16x1xf32>
    %50 = arith.mulf %34, %47 : vector<16x1xf32>
    %51 = arith.subf %49, %50 : vector<16x1xf32>
    %52 = vector.broadcast %47 : vector<16x1xf32> to vector<16x512xf32>
    %53 = arith.mulf %26, %52 : vector<16x512xf32>
    %54 = vector.broadcast %51 : vector<16x1xf32> to vector<16x512xf32>
    %55 = arith.addf %53, %54 : vector<16x512xf32>
    %cst_23 = arith.constant 0.000000e+00 : f32
    %56 = vector.broadcast %cst_23 : f32 to vector<16x512xf32>
    %57 = arith.maximumf %55, %56 : vector<16x512xf32>
    %c511_i32_24 = arith.constant 511 : i32
    %58 = tpu.dynamic_rotate %57 by %c511_i32_24 dim 1 : vector<16x512xf32>, i32 -> vector<16x512xf32>
    %c496_i32_25 = arith.constant 496 : i32
    %59 = tpu.dynamic_rotate %57 by %c496_i32_25 dim 1 : vector<16x512xf32>, i32 -> vector<16x512xf32>
    %c495_i32_26 = arith.constant 495 : i32
    %60 = tpu.dynamic_rotate %57 by %c495_i32_26 dim 1 : vector<16x512xf32>, i32 -> vector<16x512xf32>
    %61 = tpu.concatenate %57, %58, %59, %60 in 0 : vector<16x512xf32>, vector<16x512xf32>, vector<16x512xf32>, vector<16x512xf32> -> vector<64x512xf32>
    %c0_27 = arith.constant 0 : index
    %c0_28 = arith.constant 0 : index
    %62 = vector.load %arg3[%c0_27, %c0_28] : memref<32x64xf32, #tpu.memory_space<vmem>>, vector<32x64xf32>
    %cst_29 = arith.constant dense<0.000000e+00> : vector<32x512xf32>
    %63 = tpu.matmul %62, %61, %cst_29 {dimension_numbers = #tpu.dot_dimension_numbers<[1], [0], [0], [1], [0, 0, 1, 1], [], []>} : vector<32x64xf32>, vector<64x512xf32>, vector<32x512xf32> -> vector<32x512xf32>
    %c1_30 = arith.constant 1 : index
    %c0_31 = arith.constant 0 : index
    %c0_32 = arith.constant 0 : index
    %64 = vector.load %arg7[%c1_30, %c0_31, %c0_32] : memref<3x1x512xf32, #tpu.memory_space<vmem>>, vector<1x1x512xf32>
    %65 = vector.shape_cast %64 : vector<1x1x512xf32> to vector<1x512xf32>
    %66 = vector.broadcast %65 : vector<1x512xf32> to vector<32x512xf32>
    %67 = arith.mulf %63, %66 : vector<32x512xf32>
    %cst_33 = arith.constant dense<0.000000e+00> : vector<32xf32>
    %68 = vector.multi_reduction <add>, %67, %cst_33 [1] : vector<32x512xf32> to vector<32xf32>
    %69 = vector.shape_cast %68 : vector<32xf32> to vector<32x1xf32>
    %cst_34 = arith.constant 0.00255102036 : f32
    %70 = vector.broadcast %cst_34 : f32 to vector<32x1xf32>
    %71 = arith.mulf %69, %70 : vector<32x1xf32>
    %72 = arith.mulf %67, %63 : vector<32x512xf32>
    %cst_35 = arith.constant dense<0.000000e+00> : vector<32xf32>
    %73 = vector.multi_reduction <add>, %72, %cst_35 [1] : vector<32x512xf32> to vector<32xf32>
    %74 = vector.shape_cast %73 : vector<32xf32> to vector<32x1xf32>
    %cst_36 = arith.constant 0.00255102036 : f32
    %75 = vector.broadcast %cst_36 : f32 to vector<32x1xf32>
    %76 = arith.mulf %74, %75 : vector<32x1xf32>
    %77 = arith.mulf %71, %71 : vector<32x1xf32>
    %78 = arith.subf %76, %77 : vector<32x1xf32>
    %c0_37 = arith.constant 0 : index
    %c0_38 = arith.constant 0 : index
    %c0_39 = arith.constant 0 : index
    %79 = vector.load %arg4[%c0_37, %c0_38, %c0_39] : memref<2x32x1xf32, #tpu.memory_space<vmem>>, vector<1x32x1xf32>
    %80 = vector.shape_cast %79 : vector<1x32x1xf32> to vector<32x1xf32>
    %cst_40 = arith.constant 9.99999974E-6 : f32
    %81 = vector.broadcast %cst_40 : f32 to vector<32x1xf32>
    %82 = arith.addf %78, %81 : vector<32x1xf32>
    %83 = math.rsqrt %82 : vector<32x1xf32>
    %84 = arith.mulf %80, %83 : vector<32x1xf32>
    %c1_41 = arith.constant 1 : index
    %c0_42 = arith.constant 0 : index
    %c0_43 = arith.constant 0 : index
    %85 = vector.load %arg4[%c1_41, %c0_42, %c0_43] : memref<2x32x1xf32, #tpu.memory_space<vmem>>, vector<1x32x1xf32>
    %86 = vector.shape_cast %85 : vector<1x32x1xf32> to vector<32x1xf32>
    %87 = arith.mulf %71, %84 : vector<32x1xf32>
    %88 = arith.subf %86, %87 : vector<32x1xf32>
    %89 = vector.broadcast %84 : vector<32x1xf32> to vector<32x512xf32>
    %90 = arith.mulf %63, %89 : vector<32x512xf32>
    %91 = vector.broadcast %88 : vector<32x1xf32> to vector<32x512xf32>
    %92 = arith.addf %90, %91 : vector<32x512xf32>
    %cst_44 = arith.constant 0.000000e+00 : f32
    %93 = vector.broadcast %cst_44 : f32 to vector<32x512xf32>
    %94 = arith.maximumf %92, %93 : vector<32x512xf32>
    %c511_i32_45 = arith.constant 511 : i32
    %95 = tpu.dynamic_rotate %94 by %c511_i32_45 dim 1 : vector<32x512xf32>, i32 -> vector<32x512xf32>
    %c496_i32_46 = arith.constant 496 : i32
    %96 = tpu.dynamic_rotate %94 by %c496_i32_46 dim 1 : vector<32x512xf32>, i32 -> vector<32x512xf32>
    %c495_i32_47 = arith.constant 495 : i32
    %97 = tpu.dynamic_rotate %94 by %c495_i32_47 dim 1 : vector<32x512xf32>, i32 -> vector<32x512xf32>
    %98 = tpu.concatenate %94, %95, %96, %97 in 0 : vector<32x512xf32>, vector<32x512xf32>, vector<32x512xf32>, vector<32x512xf32> -> vector<128x512xf32>
    %c0_48 = arith.constant 0 : index
    %c0_49 = arith.constant 0 : index
    %99 = vector.load %arg5[%c0_48, %c0_49] : memref<32x128xf32, #tpu.memory_space<vmem>>, vector<32x128xf32>
    %cst_50 = arith.constant dense<0.000000e+00> : vector<32x512xf32>
    %100 = tpu.matmul %99, %98, %cst_50 {dimension_numbers = #tpu.dot_dimension_numbers<[1], [0], [0], [1], [0, 0, 1, 1], [], []>} : vector<32x128xf32>, vector<128x512xf32>, vector<32x512xf32> -> vector<32x512xf32>
    %c2_51 = arith.constant 2 : index
    %c0_52 = arith.constant 0 : index
    %c0_53 = arith.constant 0 : index
    %101 = vector.load %arg7[%c2_51, %c0_52, %c0_53] : memref<3x1x512xf32, #tpu.memory_space<vmem>>, vector<1x1x512xf32>
    %102 = vector.shape_cast %101 : vector<1x1x512xf32> to vector<1x512xf32>
    %103 = vector.broadcast %102 : vector<1x512xf32> to vector<32x512xf32>
    %104 = arith.mulf %100, %103 : vector<32x512xf32>
    %cst_54 = arith.constant dense<0.000000e+00> : vector<32xf32>
    %105 = vector.multi_reduction <add>, %104, %cst_54 [1] : vector<32x512xf32> to vector<32xf32>
    %106 = vector.shape_cast %105 : vector<32xf32> to vector<32x1xf32>
    %cst_55 = arith.constant 2.958580e-03 : f32
    %107 = vector.broadcast %cst_55 : f32 to vector<32x1xf32>
    %108 = arith.mulf %106, %107 : vector<32x1xf32>
    %109 = arith.mulf %104, %100 : vector<32x512xf32>
    %cst_56 = arith.constant dense<0.000000e+00> : vector<32xf32>
    %110 = vector.multi_reduction <add>, %109, %cst_56 [1] : vector<32x512xf32> to vector<32xf32>
    %111 = vector.shape_cast %110 : vector<32xf32> to vector<32x1xf32>
    %cst_57 = arith.constant 2.958580e-03 : f32
    %112 = vector.broadcast %cst_57 : f32 to vector<32x1xf32>
    %113 = arith.mulf %111, %112 : vector<32x1xf32>
    %114 = arith.mulf %108, %108 : vector<32x1xf32>
    %115 = arith.subf %113, %114 : vector<32x1xf32>
    %c0_58 = arith.constant 0 : index
    %c0_59 = arith.constant 0 : index
    %c0_60 = arith.constant 0 : index
    %116 = vector.load %arg6[%c0_58, %c0_59, %c0_60] : memref<2x32x1xf32, #tpu.memory_space<vmem>>, vector<1x32x1xf32>
    %117 = vector.shape_cast %116 : vector<1x32x1xf32> to vector<32x1xf32>
    %cst_61 = arith.constant 9.99999974E-6 : f32
    %118 = vector.broadcast %cst_61 : f32 to vector<32x1xf32>
    %119 = arith.addf %115, %118 : vector<32x1xf32>
    %120 = math.rsqrt %119 : vector<32x1xf32>
    %121 = arith.mulf %117, %120 : vector<32x1xf32>
    %c1_62 = arith.constant 1 : index
    %c0_63 = arith.constant 0 : index
    %c0_64 = arith.constant 0 : index
    %122 = vector.load %arg6[%c1_62, %c0_63, %c0_64] : memref<2x32x1xf32, #tpu.memory_space<vmem>>, vector<1x32x1xf32>
    %123 = vector.shape_cast %122 : vector<1x32x1xf32> to vector<32x1xf32>
    %124 = arith.mulf %108, %121 : vector<32x1xf32>
    %125 = arith.subf %123, %124 : vector<32x1xf32>
    %126 = vector.broadcast %121 : vector<32x1xf32> to vector<32x512xf32>
    %127 = arith.mulf %100, %126 : vector<32x512xf32>
    %128 = vector.broadcast %125 : vector<32x1xf32> to vector<32x512xf32>
    %129 = arith.addf %127, %128 : vector<32x512xf32>
    %cst_65 = arith.constant 0.000000e+00 : f32
    %130 = vector.broadcast %cst_65 : f32 to vector<32x512xf32>
    %131 = arith.maximumf %129, %130 : vector<32x512xf32>
    %c0_66 = arith.constant 0 : index
    %c0_67 = arith.constant 0 : index
    %132 = vector.load %arg8[%c0_66, %c0_67] : memref<128x512xf32, #tpu.memory_space<vmem>>, vector<128x512xf32>
    %133 = tpu.concatenate %131, %131, %131, %131 in 0 : vector<32x512xf32>, vector<32x512xf32>, vector<32x512xf32>, vector<32x512xf32> -> vector<128x512xf32>
    %134 = arith.mulf %132, %133 : vector<128x512xf32>
    %c0_68 = arith.constant 0 : index
    %c0_69 = arith.constant 0 : index
    %135 = vector.load %arg10[%c0_68, %c0_69] : memref<512x2xf32, #tpu.memory_space<vmem>>, vector<512x2xf32>
    %cst_70 = arith.constant dense<0.000000e+00> : vector<128x2xf32>
    %136 = tpu.matmul %134, %135, %cst_70 {dimension_numbers = #tpu.dot_dimension_numbers<[1], [0], [0], [1], [0, 0, 1, 1], [], []>} : vector<128x512xf32>, vector<512x2xf32>, vector<128x2xf32> -> vector<128x2xf32>
    %c0_71 = arith.constant 0 : index
    %c0_72 = arith.constant 0 : index
    %137 = vector.load %arg11[%c0_71, %c0_72] : memref<4x128xf32, #tpu.memory_space<vmem>>, vector<4x128xf32>
    %cst_73 = arith.constant dense<0.000000e+00> : vector<4x2xf32>
    %138 = tpu.matmul %137, %136, %cst_73 {dimension_numbers = #tpu.dot_dimension_numbers<[1], [0], [0], [1], [0, 0, 1, 1], [], []>} : vector<4x128xf32>, vector<128x2xf32>, vector<4x2xf32> -> vector<4x2xf32>
    %c0_74 = arith.constant 0 : index
    %c0_75 = arith.constant 0 : index
    %139 = vector.load %arg9[%c0_74, %c0_75] : memref<4x1xf32, #tpu.memory_space<vmem>>, vector<4x1xf32>
    %140 = vector.broadcast %139 : vector<4x1xf32> to vector<4x2xf32>
    %141 = arith.addf %138, %140 : vector<4x2xf32>
    %c0_76 = arith.constant 0 : index
    %c0_77 = arith.constant 0 : index
    %142 = vector.load %arg12[%c0_76, %c0_77] : memref<4x2xf32, #tpu.memory_space<vmem>>, vector<4x2xf32>
    tpu.vector_store %arg12[%c0_76, %c0_77], %141 {strides = array<i32>} : memref<4x2xf32, #tpu.memory_space<vmem>>, vector<4x2xf32>,
    return
  }
}

</mosaic_0001>

<bundles_post_ra>
// kernel: tpu_custom_call.1
= control target key start
LH: loop header
LB: loop body
LE: loop exit
PB: predicated region body
PF: predicated region fallthrough
CT: control target
= control target key end

     0   :  { %v2041_v1 = vmov 0   ;;  %s2042_s23 = smov 127   ;;  %s2043_s24 = smov 112   ;;  %v59_v22 = vlaneseq  ;;  %vm418_vm9 = vcmask 523264   ;;  %s3631_s0 = inlined_call_operand.vmem [shape: f32[1,512], index: 0, kind: input, shape index: {}]   ;;  %s3632_s1 = inlined_call_operand.vmem [shape: f32[4,16,1], index: 1, kind: input, shape index: {}]   ;;  %s3633_s7 = inlined_call_operand.vmem [shape: f32[3,1,512], index: 7, kind: input, shape index: {}]   ;;  %s3634_s2 = inlined_call_operand.vmem [shape: f32[2,16,1], index: 2, kind: input, shape index: {}]   ;;  %s3635_s3 = inlined_call_operand.vmem [shape: f32[32,64], index: 3, kind: input, shape index: {}]   ;;  %s3636_s4 = inlined_call_operand.vmem [shape: f32[2,32,1], index: 4, kind: input, shape index: {}]   ;;  %s3637_s5 = inlined_call_operand.vmem [shape: f32[32,128], index: 5, kind: input, shape index: {}]   ;;  %s3638_s6 = inlined_call_operand.vmem [shape: f32[2,32,1], index: 6, kind: input, shape index: {}]   ;;  %s3639_s10 = inlined_call_operand.vmem [shape: f32[512,2], index: 10, kind: input, shape index: {}]   ;;  %s3640_s9 = inlined_call_operand.vmem [shape: f32[4,1], index: 9, kind: input, shape index: {}]   ;;  %s3641_s8 = inlined_call_operand.vmem [shape: f32[128,512], index: 8, kind: input, shape index: {}]   ;;  %s3642_s11 = inlined_call_operand.vmem [shape: f32[4,128], index: 11, kind: input, shape index: {}]   ;;  %s3643_s12 = inlined_call_operand.vmem [shape: f32[4,2], index: 12, kind: output, shape index: {}]  }
   0x1   :  { %v41_v0 = vld [vmem:[%s3631_s0] sm:$0xf]  ;;  %1839 = vset.pattern.permute.xlu2 %v2041_v1  ;;  %1838 = vset.pattern.permute.xlu1 %v2041_v1  ;;  %v93_v6 = vld [vmem:[%s3632_s1 + $0x8] sm:$0xff]  ;;  %v1801_v7 = vld [vmem:[%s3632_s1 + $0x18] sm:$0xff]  ;;  %s2044_s28 = smov 111  }
   0x2   :  { %v2113_v2 = vperm.slane %v41_v0, 2  ;;  %v2115_v3 = vperm.slane %v41_v0, 0  ;;  %1840 = vset.pattern.permute.xlu0 %v2041_v1  ;;  %v2123_v4 = vperm.slane %v41_v0, 3  ;;  %v2125_v5 = vperm.slane %v41_v0, 1  ;;  %v92_v8 = vld [vmem:[%s3632_s1] sm:$0xff]  ;;  %v1800_v9 = vld [vmem:[%s3632_s1 + $0x10] sm:$0xff] }
   0x3   :  { %v1802_v10 = vld [vmem:[%s3632_s1 + $0x20] sm:$0xff]  ;;  %v1803_v11 = vld [vmem:[%s3632_s1 + $0x28] sm:$0xff]  ;;  %v1805_v12 = vld [vmem:[%s3632_s1 + $0x38] sm:$0xff]  ;;  %v2173_v26 = vand.u32 127, %v59_v22 }
   0x4   :  { %55 = vrot.lane.b32.xlu1 %v2113_v2, %s2042_s23  ;;  %66 = vrot.lane.b32.xlu2 %v2115_v3, %s2043_s24  ;;  %v1804_v13 = vld [vmem:[%s3632_s1 + $0x30] sm:$0xff]  ;;  %v2197_v39 = vld [vmem:[%s3633_s7] sm:$0xf] }
   0x5   :  { %51 = vrot.lane.b32.xlu0 %v2115_v3, %s2042_s23  ;;  %vm61_vm0 = vcmp.lt.s32.totalorder %v2173_v26, 127  ;;  %vm74_vm1 = vcmp.lt.s32.totalorder %v2173_v26, 112  ;;  %vm87_vm2 = vcmp.lt.s32.totalorder %v2173_v26, 111  ;;  %v213_v44 = vperm.slane %v2197_v39, 0  ;;  %v944_v26 = vld [vmem:[%s3637_s5 + $0x8] sm:$0xff] }
   0x6   :  { %v214_v45 = vperm.slane %v2197_v39, 1 }
   0xc   :  { %57 = vrot.lane.b32.xlu1 %v2123_v4, %s2042_s23  ;;  %68 = vrot.lane.b32.xlu2 %v2125_v5, %s2043_s24 }
   0xd   :  { %53 = vrot.lane.b32.xlu0 %v2125_v5, %s2042_s23 }
  0x14   :  { %101 = vperm.xlu1 %1838, %v93_v6   ;;  %122 = vperm.xlu2 %1839, %v1801_v7  }
  0x15   :  { %70 = vrot.lane.b32.xlu0 %v2113_v2, %s2043_s24 }
  0x1c   :  { %79 = vrot.lane.b32.xlu1 %v2115_v3, %s2044_s28  ;;  %81 = vrot.lane.b32.xlu2 %v2125_v5, %s2044_s28 }
  0x1d   :  { %72 = vrot.lane.b32.xlu0 %v2123_v4, %s2043_s24 }
  0x24   :  { %96 = vperm.xlu1 %1838, %v92_v8   ;;  %117 = vperm.xlu2 %1839, %v1800_v9  }
  0x25   :  { %83 = vrot.lane.b32.xlu0 %v2113_v2, %s2044_s28 }
  0x2c   :  { %85 = vrot.lane.b32.xlu1 %v2123_v4, %s2044_s28  ;;  %150 = vperm.xlu2 %1839, %v1802_v10  }
  0x2d   :  { %155 = vperm.xlu0 %1840, %v1803_v11  }
  0x34   :  { %188 = vperm.xlu1 %1838, %v1805_v12   ;;  %183 = vperm.xlu2 %1839, %v1804_v13  }
  0x5e   :  { %v67_v14 = vpop.permute.xlu2 %66 }
  0x66   :  { %v69_v15 = vpop.permute.xlu2 %68 }
  0x67   :  { %v2188_v33 = vsel %vm74_vm1, %v67_v14, %v69_v15 }
  0x68   :  { %v158_v41 = vperm.slane %v2188_v33, 0 }
  0x6e   :  { %v2169_v16 = vpop.permute.xlu2 %122 }
  0x76   :  { %v56_v17 = vpop.permute.xlu1 %55  ;;  %v82_v19 = vpop.permute.xlu2 %81 }
  0x77   :  { %v52_v18 = vpop.permute.xlu0 %51 }
  0x7e   :  { %v58_v20 = vpop.permute.xlu1 %57  ;;  %v118_v23 = vpop.permute.xlu2 %117 }
  0x7f   :  { %v54_v21 = vpop.permute.xlu0 %53  ;;  %v62_v28 = vsel %vm61_vm0, %v56_v17, %v58_v20  ;;  %v65_v34 = vsel %vm61_vm0, %v58_v20, %v52_v18 }
  0x80   :  { %v63_v29 = vsel %vm61_vm0, %v54_v21, %v56_v17  ;;  %v64_v30 = vsel %vm61_vm0, %v52_v18, %v54_v21  ;;  %v127_v35 = vperm.slane %v62_v28, 0  ;;  %v128_v42 = vperm.slane %v65_v34, 0 }
  0x81   :  { %v125_v36 = vperm.slane %v64_v30, 0  ;;  %v126_v37 = vperm.slane %v63_v29, 0  ;;  %v215_v21 = vperm.slane %v2197_v39, 2 }
  0x82   :  { %v135_v46 = vmul.f32 %v127_v35, %v2169_v16  ;;  %v131_v56 = vmul.f32 %v127_v35, %v118_v23  ;;  %v132_v0 = vmul.f32 %v128_v42, %v118_v23  ;;  %v136_v9 = vmul.f32 %v128_v42, %v2169_v16 }
  0x83   :  { %v129_v47 = vmul.f32 %v125_v36, %v118_v23  ;;  %v130_v48 = vmul.f32 %v126_v37, %v118_v23  ;;  %v133_v13 = vmul.f32 %v125_v36, %v2169_v16  ;;  %v134_v18 = vmul.f32 %v126_v37, %v2169_v16 }
  0x86   :  { %v2171_v24 = vpop.permute.xlu1 %101  ;;  %v151_v32 = vpop.permute.xlu2 %150 }
  0x87   :  { %v71_v25 = vpop.permute.xlu0 %70  ;;  %v162_v60 = vmul.f32 %v158_v41, %v151_v32  ;;  %v109_v22 = vmul.f32 %v2171_v24, %v2125_v5  ;;  %v110_v30 = vmul.f32 %v2171_v24, %v2113_v2  ;;  %v111_v16 = vmul.f32 %v2171_v24, %v2123_v4 }
  0x88   :  { %v76_v38 = vsel %vm74_vm1, %v69_v15, %v71_v25 }
  0x89   :  { %v159_v43 = vperm.slane %v76_v38, 0 }
  0x8b   :  { %v163_v61 = vmul.f32 %v159_v43, %v151_v32 }
  0x8e   :  { %v2177_v27 = vpop.permute.xlu1 %79  ;;  %v184_v1 = vpop.permute.xlu2 %183 }
  0x8f   :  { %v73_v31 = vpop.permute.xlu0 %72  ;;  %v2202_v40 = vsel %vm87_vm2, %v2177_v27, %v82_v19 }
  0x90   :  { %v191_v49 = vperm.slane %v2202_v40, 0  ;;  %v75_v51 = vsel %vm74_vm1, %v71_v25, %v73_v31  ;;  %v78_v52 = vsel %vm74_vm1, %v73_v31, %v67_v14 }
  0x91   :  { %v160_v6 = vperm.slane %v75_v51, 0  ;;  %v161_v7 = vperm.slane %v78_v52, 0  ;;  %v143_v51 = vadd.f32 %v135_v46, %v110_v30  ;;  %v144_v52 = vadd.f32 %v136_v9, %v111_v16 }
  0x92   :  { %v195_v10 = vmul.f32 %v191_v49, %v184_v1 }
  0x93   :  { %v164_v23 = vmul.f32 %v160_v6, %v151_v32  ;;  %v165_v25 = vmul.f32 %v161_v7, %v151_v32 }
  0x96   :  { %v97_v50 = vpop.permute.xlu1 %96 }
  0x97   :  { %v104_v53 = vmul.f32 %v97_v50, %v2115_v3  ;;  %v105_v54 = vmul.f32 %v97_v50, %v2125_v5  ;;  %v84_v55 = vpop.permute.xlu0 %83  ;;  %v106_v57 = vmul.f32 %v97_v50, %v2113_v2  ;;  %v107_v58 = vmul.f32 %v97_v50, %v2123_v4 }
  0x98   :  { %v89_v59 = vsel %vm87_vm2, %v82_v19, %v84_v55  ;;  %v108_v19 = vmul.f32 %v2171_v24, %v2115_v3  ;;  %v216_v50 = vperm.slane %v2197_v39, 3 }
  0x99   :  { %v137_v62 = vadd.f32 %v129_v47, %v104_v53  ;;  %v138_v63 = vadd.f32 %v130_v48, %v105_v54  ;;  %v192_v8 = vperm.slane %v89_v59, 0  ;;  %v139_v14 = vadd.f32 %v131_v56, %v106_v57 }
  0x9a   :  { %v140_v15 = vadd.f32 %v132_v0, %v107_v58  ;;  %v142_v48 = vadd.f32 %v134_v18, %v109_v22 }
  0x9b   :  { %v170_v11 = vadd.f32 %v162_v60, %v137_v62  ;;  %v171_v12 = vadd.f32 %v163_v61, %v138_v63  ;;  %v196_v17 = vmul.f32 %v192_v8, %v184_v1  ;;  %v172_v5 = vadd.f32 %v164_v23, %v139_v14 }
  0x9c   :  { %v173_v34 = vadd.f32 %v165_v25, %v140_v15 }
  0x9d   :  { %v2226_v20 = vadd.f32 %v195_v10, %v170_v11  ;;  %v2231_v28 = vadd.f32 %v196_v17, %v171_v12 }
  0x9e   :  { %v86_v29 = vpop.permute.xlu1 %85 }
  0x9f   :  { %v88_v3 = vsel %vm87_vm2, %v84_v55, %v86_v29  ;;  %v91_v31 = vsel %vm87_vm2, %v86_v29, %v2177_v27  ;;  %v156_v33 = vpop.permute.xlu0 %155  ;;  %v221_v2 = vmul.f32 %v213_v44, %v2226_v20  ;;  %v222_v47 = vmul.f32 %v214_v45, %v2231_v28 }
  0xa0   :  { %v193_v32 = vperm.slane %v88_v3, 0  ;;  %v194_v35 = vperm.slane %v91_v31, 0  ;;  %v166_v36 = vmul.f32 %v158_v41, %v156_v33  ;;  %v167_v37 = vmul.f32 %v159_v43, %v156_v33 }
  0xa1   :  { %v168_v38 = vmul.f32 %v160_v6, %v156_v33  ;;  %v169_v42 = vmul.f32 %v161_v7, %v156_v33  ;;  %v141_v27 = vadd.f32 %v133_v13, %v108_v19  ;;  %v229_v59 = vadd.f32 %v222_v47, %v221_v2 }
  0xa2   :  { %v197_v4 = vmul.f32 %v193_v32, %v184_v1  ;;  %v198_v24 = vmul.f32 %v194_v35, %v184_v1  ;;  %v175_v54 = vadd.f32 %v167_v37, %v142_v48 }
  0xa3   :  { %v174_v53 = vadd.f32 %v166_v36, %v141_v27  ;;  %v176_v55 = vadd.f32 %v168_v38, %v143_v51  ;;  %v177_v56 = vadd.f32 %v169_v42, %v144_v52 }
  0xa4   :  { %v2249_v41 = vadd.f32 %v197_v4, %v172_v5  ;;  %v2251_v43 = vadd.f32 %v198_v24, %v173_v34 }
  0xa6   :  { %v189_v57 = vpop.permute.xlu1 %188  ;;  %v223_v58 = vmul.f32 %v215_v21, %v2249_v41  ;;  %v224_v46 = vmul.f32 %v216_v50, %v2251_v43 }
  0xa7   :  { %v199_v60 = vmul.f32 %v191_v49, %v189_v57  ;;  %v200_v61 = vmul.f32 %v192_v8, %v189_v57  ;;  %v201_v62 = vmul.f32 %v193_v32, %v189_v57  ;;  %v202_v63 = vmul.f32 %v194_v35, %v189_v57 }
  0xa8   :  { %v230_v0 = vadd.f32 %v229_v59, %v223_v58  ;;  %v243_v23 = vmul.f32 %v223_v58, %v2249_v41  ;;  %v244_v30 = vmul.f32 %v224_v46, %v2251_v43 }
  0xa9   :  { %v2257_v1 = vadd.f32 %v199_v60, %v174_v53  ;;  %v2259_v6 = vadd.f32 %v200_v61, %v175_v54  ;;  %v2261_v7 = vadd.f32 %v201_v62, %v176_v55  ;;  %v2263_v9 = vadd.f32 %v202_v63, %v177_v56  ;;  %v266_v54 = vld [vmem:[%s3634_s2 + $0x8] sm:$0xff]  ;;  %v1807_v60 = vld [vmem:[%s3634_s2 + $0x18] sm:$0xff] }
  0xaa   :  { %v231_v10 = vadd.f32 %v230_v0, %v224_v46  ;;  %v265_v46 = vld [vmem:[%s3634_s2] sm:$0xff] }
  0xab   :  { %v225_v40 = vmul.f32 %v213_v44, %v2257_v1  ;;  %v226_v49 = vmul.f32 %v214_v45, %v2259_v6  ;;  %v227_v8 = vmul.f32 %v215_v21, %v2261_v7  ;;  %v228_v11 = vmul.f32 %v216_v50, %v2263_v9 }
  0xac   :  { %232 = vadd.xlane.f32.xlu1 %v231_v10  ;;  %v241_v44 = vmul.f32 %v221_v2, %v2226_v20  ;;  %v242_v21 = vmul.f32 %v222_v47, %v2231_v28 }
  0xad   :  { %v234_v12 = vadd.f32 %v226_v49, %v225_v40  ;;  %v245_v13 = vmul.f32 %v225_v40, %v2257_v1  ;;  %v246_v14 = vmul.f32 %v226_v49, %v2259_v6  ;;  %v247_v17 = vmul.f32 %v227_v8, %v2261_v7  ;;  %v1806_v49 = vld [vmem:[%s3634_s2 + $0x10] sm:$0xff] }
  0xae   :  { %v248_v39 = vmul.f32 %v228_v11, %v2263_v9  ;;  %v249_v25 = vadd.f32 %v242_v21, %v241_v44 }
  0xaf   :  { %v235_v15 = vadd.f32 %v234_v12, %v227_v8  ;;  %v254_v18 = vadd.f32 %v246_v14, %v245_v13 }
  0xb0   :  { %v250_v29 = vadd.f32 %v249_v25, %v243_v23 }
  0xb1   :  { %v236_v19 = vadd.f32 %v235_v15, %v228_v11  ;;  %v255_v45 = vadd.f32 %v254_v18, %v247_v17 }
  0xb2   :  { %v251_v16 = vadd.f32 %v250_v29, %v244_v30 }
  0xb3   :  { %237 = vadd.xlane.f32.xlu0 %v236_v19  ;;  %v256_v22 = vadd.f32 %v255_v45, %v248_v39 }
  0xb5   :  { %257 = vadd.xlane.f32.xlu2 %v256_v22 }
  0xbd   :  { %252 = vadd.xlane.f32.xlu2 %v251_v16 }
 0x11f   :  { %v233_v32 = vpop.xlane.xlu1 %232 }
 0x120   :  { %v239_v36 = vmul.f32 0.0022222223, %v233_v32 }
 0x122   :  { %v261_v2 = vmul.f32 %v239_v36, %v239_v36 }
 0x126   :  { %v238_v3 = vpop.xlane.xlu0 %237 }
 0x127   :  { %v240_v31 = vmul.f32 0.0022222223, %v238_v3 }
 0x128   :  { %v258_v33 = vpop.xlane.xlu2 %257 }
 0x129   :  { %v262_v5 = vmul.f32 %v240_v31, %v240_v31  ;;  %v260_v34 = vmul.f32 0.0022222223, %v258_v33 }
 0x12b   :  { %v264_v35 = vsub.f32 %v260_v34, %v262_v5 }
 0x12d   :  { %v268_v37 = vadd.f32 1e-05, %v264_v35 }
 0x12f   :  { %2021 = vrsqrt.f32 %v268_v37  ;;  %vm285_vm4 = vweird.f32 %v268_v37 }
 0x130   :  { %v253_v38 = vpop.xlane.xlu2 %252 }
 0x131   :  { %v259_v4 = vmul.f32 0.0022222223, %v253_v38 }
 0x133   :  { %v263_v24 = vsub.f32 %v259_v4, %v261_v2 }
 0x135   :  { %v2022_v42 = vpop.eup %2021  ;;  %v267_v47 = vadd.f32 1e-05, %v263_v24 }
 0x136   :  { %v280_v27 = vmul.f32 %v2022_v42, %v268_v37  ;;  %vm286_vm3 = vweird.f32 %v2022_v42 }
 0x137   :  { %2023 = vrsqrt.f32 %v267_v47  ;;  %vm287_vm5 = vmor %vm285_vm4, %vm286_vm3  ;;  %vm275_vm7 = vweird.f32 %v267_v47 }
 0x138   :  { %v281_v48 = vmul.f32 %v2022_v42, %v280_v27 }
 0x13a   :  { %v282_v50 = vmul.f32 0.5, %v281_v48 }
 0x13c   :  { %v283_v51 = vsub.f32 1.5, %v282_v50 }
 0x13d   :  { %v2024_v52 = vpop.eup %2023 }
 0x13e   :  { %v270_v53 = vmul.f32 %v2024_v52, %v267_v47  ;;  %v284_v55 = vmul.f32 %v2022_v42, %v283_v51  ;;  %vm276_vm6 = vweird.f32 %v2024_v52 }
 0x13f   :  { %vm277_vm8 = vmor %vm275_vm7, %vm276_vm6 }
 0x140   :  { %v271_v56 = vmul.f32 %v2024_v52, %v270_v53  ;;  %v288_v57 = vsel %vm287_vm5, %v2022_v42, %v284_v55 }
 0x141   :  { %v290_v58 = vmul.f32 %v288_v57, %v266_v54 }
 0x142   :  { %v272_v59 = vmul.f32 0.5, %v271_v56 }
 0x143   :  { %305 = vperm.xlu0 %1840, %v290_v58   ;;  %v295_v61 = vmul.f32 %v290_v58, %v240_v31 }
 0x144   :  { %v273_v62 = vsub.f32 1.5, %v272_v59 }
 0x145   :  { %v297_v63 = vsub.f32 %v1807_v60, %v295_v61 }
 0x146   :  { %v274_v0 = vmul.f32 %v2024_v52, %v273_v62 }
 0x147   :  { %323 = vperm.xlu2 %1839, %v297_v63  }
 0x148   :  { %v278_v10 = vsel %vm277_vm8, %v2024_v52, %v274_v0 }
 0x149   :  { %v289_v40 = vmul.f32 %v278_v10, %v265_v46 }
 0x14b   :  { %300 = vperm.xlu1 %1838, %v289_v40   ;;  %v294_v8 = vmul.f32 %v289_v40, %v239_v36 }
 0x14d   :  { %v296_v11 = vsub.f32 %v1806_v49, %v294_v8 }
 0x14f   :  { %318 = vperm.xlu0 %1840, %v296_v11  }
 0x1a1   :  { %v324_v15 = vpop.permute.xlu2 %323 }
 0x1b5   :  { %v306_v12 = vpop.permute.xlu0 %305 }
 0x1b6   :  { %v314_v13 = vmul.f32 %v306_v12, %v2261_v7  ;;  %v315_v14 = vmul.f32 %v306_v12, %v2263_v9  ;;  %v312_v39 = vmul.f32 %v306_v12, %v2257_v1  ;;  %v313_v16 = vmul.f32 %v306_v12, %v2259_v6 }
 0x1b8   :  { %v2295_v17 = vadd.f32 %v324_v15, %v314_v13  ;;  %v2297_v18 = vadd.f32 %v324_v15, %v315_v14  ;;  %v2307_v7 = vadd.f32 %v324_v15, %v312_v39  ;;  %v2335_v6 = vadd.f32 %v324_v15, %v313_v16 }
 0x1ba   :  { %v340_v44 = vmax.f32 %v2295_v17, 0.0  ;;  %v341_v19 = vmax.f32 %v2297_v18, 0.0  ;;  %v338_v3 = vmax.f32 %v2307_v7, 0.0  ;;  %v339_v32 = vmax.f32 %v2335_v6, 0.0  ;;  %v415_v17 = vld [vmem:[%s3635_s3 + $0x8] sm:$0xff]  ;;  %v416_v18 = vld [vmem:[%s3635_s3 + $0x10] sm:$0xff] }
 0x1bc   :  { %v1841_v45 = vpack.i.bf16 %v341_v19, %v340_v44 }
 0x1bd   :  { %v301_v21 = vpop.permute.xlu1 %300 }
 0x1be   :  { %1842 = vrot.lane.b32.xlu1 %v1841_v45, %s2044_s28  ;;  %v308_v9 = vmul.f32 %v301_v21, %v2226_v20  ;;  %v310_v22 = vmul.f32 %v301_v21, %v2249_v41  ;;  %v311_v23 = vmul.f32 %v301_v21, %v2251_v43  ;;  %v309_v31 = vmul.f32 %v301_v21, %v2231_v28 }
 0x1c1   :  { %v319_v25 = vpop.permute.xlu0 %318 }
 0x1c2   :  { %v2312_v29 = vadd.f32 %v319_v25, %v308_v9  ;;  %v2314_v1 = vadd.f32 %v319_v25, %v310_v22  ;;  %v2316_v30 = vadd.f32 %v319_v25, %v311_v23  ;;  %v2324_v43 = vadd.f32 %v319_v25, %v309_v31 }
 0x1c4   :  { %v334_v33 = vmax.f32 %v2312_v29, 0.0  ;;  %v336_v20 = vmax.f32 %v2314_v1, 0.0  ;;  %v337_v41 = vmax.f32 %v2316_v30, 0.0  ;;  %v335_v34 = vmax.f32 %v2324_v43, 0.0  ;;  %v1824_v1 = vld [vmem:[%s3633_s7 + $0x4] sm:$0xf] }
 0x1c6   :  { %1857 = vrot.lane.b32.xlu1 %v1841_v45, %s2043_s24  ;;  %v1851_v5 = vpack.i.bf16 %v334_v33, %v337_v41  ;;  %v1846_v28 = vpack.i.bf16 %v336_v20, %v338_v3  ;;  %v1861_v35 = vpack.i.bf16 %v335_v34, %v339_v32 }
 0x1c8   :  { %1852 = vrot.lane.b32.xlu2 %v1851_v5, %s2044_s28  ;;  %1847 = vrot.lane.b32.xlu0 %v1846_v28, %s2044_s28 }
 0x1ce   :  { %1872 = vrot.lane.b32.xlu1 %v1851_v5, %s2043_s24 }
 0x1d0   :  { %1867 = vrot.lane.b32.xlu2 %v1846_v28, %s2043_s24  ;;  %1862 = vrot.lane.b32.xlu0 %v1861_v35, %s2044_s28 }
 0x1d6   :  { %1887 = vrot.lane.b32.xlu1 %v1846_v28, %s2042_s23 }
 0x1d8   :  { %1882 = vrot.lane.b32.xlu2 %v1861_v35, %s2043_s24  ;;  %1877 = vrot.lane.b32.xlu0 %v1841_v45, %s2042_s23 }
 0x1e0   :  { %1897 = vrot.lane.b32.xlu2 %v1861_v35, %s2042_s23  ;;  %1892 = vrot.lane.b32.xlu0 %v1851_v5, %s2042_s23 }
 0x222   :  { %v1853_v36 = vpop.permute.xlu2 %1852 }
 0x223   :  { %v1855_v47 = vunpack.i.h.bf16 %v1853_v36  ;;  %v1854_v27 = vunpack.i.l.bf16 %v1853_v36 }
 0x225   :  { %v412_v59 = vsel %vm87_vm2, %v1854_v27, %v1855_v47 }
 0x22a   :  { %v1868_v4 = vpop.permute.xlu2 %1867 }
 0x22b   :  { %v1869_v57 = vunpack.i.l.bf16 %v1868_v4  ;;  %v1870_v61 = vunpack.i.h.bf16 %v1868_v4 }
 0x230   :  { %v1843_v37 = vpop.permute.xlu1 %1842 }
 0x231   :  { %v1845_v38 = vunpack.i.h.bf16 %v1843_v37  ;;  %v1844_v2 = vunpack.i.l.bf16 %v1843_v37 }
 0x232   :  { %v1883_v54 = vpop.permute.xlu2 %1882 }
 0x233   :  { %v407_v24 = vsel %vm87_vm2, %v1844_v2, %v1845_v38  ;;  %v1884_v11 = vunpack.i.l.bf16 %v1883_v54  ;;  %v1885_v14 = vunpack.i.h.bf16 %v1883_v54 }
 0x234   :  { %497 = vmatpush.msra.mxu2 %v407_v24 }
 0x235   :  { %v387_v22 = vsel %vm74_vm1, %v1869_v57, %v1884_v11  ;;  %v384_v31 = vsel %vm74_vm1, %v1885_v14, %v1870_v61 }
 0x238   :  { %v1858_v42 = vpop.permute.xlu1 %1857 }
 0x239   :  { %v1860_v50 = vunpack.i.h.bf16 %v1858_v42  ;;  %v1859_v51 = vunpack.i.l.bf16 %v1858_v42 }
 0x23a   :  { %v1848_v48 = vpop.permute.xlu0 %1847  ;;  %v1898_v15 = vpop.permute.xlu2 %1897 }
 0x23b   :  { %v1850_v52 = vunpack.i.h.bf16 %v1848_v48  ;;  %v1849_v53 = vunpack.i.l.bf16 %v1848_v48  ;;  %v383_v58 = vsel %vm74_vm1, %v1859_v51, %v1860_v50  ;;  %v389_v46 = vsel %vm74_vm1, %v1860_v50, %v1869_v57  ;;  %v414_v50 = vld [vmem:[%s3635_s3] sm:$0xff] }
 0x23c   :  { %v385_v23 = vsel %vm74_vm1, %v1884_v11, %v1859_v51  ;;  %v1899_v25 = vunpack.i.l.bf16 %v1898_v15  ;;  %v1900_v37 = vunpack.i.h.bf16 %v1898_v15 }
 0x23d   :  { %v406_v55 = vsel %vm87_vm2, %v1850_v52, %v1854_v27  ;;  %v413_v56 = vsel %vm87_vm2, %v1845_v38, %v1849_v53 }
 0x23e   :  { %498 = vmatpush.msra.mxu2 %v406_v55  ;;  %526 = vmatpush.msra.mxu3 %v413_v56  ;;  %v553_v56 = vperm.slane %v1824_v1, 3 }
 0x240   :  { %v1873_v60 = vpop.permute.xlu1 %1872  ;;  %499 = vmatpush.msra.mxu2 %v383_v58  ;;  %527 = vmatpush.msra.mxu3 %v412_v59 }
 0x241   :  { %v1875_v62 = vunpack.i.h.bf16 %v1873_v60  ;;  %v1874_v63 = vunpack.i.l.bf16 %v1873_v60 }
 0x242   :  { %v1863_v0 = vpop.permute.xlu0 %1862  ;;  %528 = vmatpush.msra.mxu3 %v389_v46 }
 0x243   :  { %v1865_v10 = vunpack.i.h.bf16 %v1863_v0  ;;  %v1864_v40 = vunpack.i.l.bf16 %v1863_v0  ;;  %v382_v49 = vsel %vm74_vm1, %v1870_v61, %v1874_v63  ;;  %v388_v8 = vsel %vm74_vm1, %v1874_v63, %v1875_v62 }
 0x244   :  { %500 = vmatpush.msra.mxu2 %v382_v49  ;;  %529 = vmatpush.msra.mxu3 %v388_v8  ;;  %v386_v36 = vsel %vm74_vm1, %v1875_v62, %v1885_v14 }
 0x245   :  { %v411_v12 = vsel %vm87_vm2, %v1849_v53, %v1864_v40  ;;  %v409_v13 = vsel %vm87_vm2, %v1864_v40, %v1844_v2  ;;  %v410_v39 = vsel %vm87_vm2, %v1855_v47, %v1865_v10  ;;  %v408_v45 = vsel %vm87_vm2, %v1865_v10, %v1850_v52 }
 0x246   :  { %439 = vmatpush.msra.mxu0 %v411_v12  ;;  %468 = vmatpush.msra.mxu1 %v409_v13  ;;  %v552_v53 = vperm.slane %v1824_v1, 2 }
 0x248   :  { %v1888_v21 = vpop.permute.xlu1 %1887  ;;  %440 = vmatpush.msra.mxu0 %v410_v39  ;;  %469 = vmatpush.msra.mxu1 %v408_v45 }
 0x249   :  { %v1889_v9 = vunpack.i.l.bf16 %v1888_v21  ;;  %v1890_v5 = vunpack.i.h.bf16 %v1888_v21 }
 0x24a   :  { %v1878_v16 = vpop.permute.xlu0 %1877  ;;  %441 = vmatpush.msra.mxu0 %v387_v22  ;;  %470 = vmatpush.msra.mxu1 %v385_v23 }
 0x24b   :  { %v1880_v28 = vunpack.i.h.bf16 %v1878_v16  ;;  %v1879_v35 = vunpack.i.l.bf16 %v1878_v16  ;;  %v363_v38 = vsel %vm61_vm0, %v1889_v9, %v1899_v25  ;;  %v360_v42 = vsel %vm61_vm0, %v1900_v37, %v1890_v5 }
 0x24c   :  { %442 = vmatpush.msra.mxu0 %v386_v36  ;;  %471 = vmatpush.msra.mxu1 %v384_v31 }
 0x24d   :  { %v361_v2 = vsel %vm61_vm0, %v1899_v25, %v1879_v35  ;;  %v359_v4 = vsel %vm61_vm0, %v1879_v35, %v1880_v28  ;;  %v365_v24 = vsel %vm61_vm0, %v1880_v28, %v1889_v9 }
 0x24e   :  { %443 = vmatpush.msra.mxu0 %v363_v38  ;;  %472 = vmatpush.msra.mxu1 %v361_v2 }
 0x24f   :  { %501 = vmatpush.msra.mxu2 %v359_v4  ;;  %530 = vmatpush.msra.mxu3 %v365_v24 }
 0x250   :  { %473 = vmatpush.msra.mxu1 %v360_v42 }
 0x252   :  { %v1893_v47 = vpop.permute.xlu0 %1892  ;;  %474 = vmatpush.msra.mxu1 %v339_v32 }
 0x253   :  { %v1895_v27 = vunpack.i.h.bf16 %v1893_v47  ;;  %v1894_v48 = vunpack.i.l.bf16 %v1893_v47 }
 0x254   :  { %475 = vmatpush.msra.mxu1 %v335_v34 }
 0x255   :  { %v362_v51 = vsel %vm61_vm0, %v1895_v27, %v1900_v37  ;;  %v358_v52 = vsel %vm61_vm0, %v1890_v5, %v1894_v48  ;;  %v364_v6 = vsel %vm61_vm0, %v1894_v48, %v1895_v27  ;;  %1812 = vmatmul.msk.f32.vlgmr.msra.gmra.mxu1 %vm418_vm9, %v414_v50 }
 0x256   :  { %444 = vmatpush.msra.mxu0 %v362_v51  ;;  %502 = vmatpush.msra.mxu2 %v358_v52 }
 0x257   :  { %531 = vmatpush.msra.mxu3 %v364_v6 }
 0x258   :  { %445 = vmatpush.msra.mxu0 %v338_v3  ;;  %503 = vmatpush.msra.mxu2 %v340_v44  ;;  %v417_v44 = vld [vmem:[%s3635_s3 + $0x18] sm:$0xff] }
 0x259   :  { %532 = vmatpush.msra.mxu3 %v341_v19 }
 0x25a   :  { %446 = vmatpush.msra.mxu0 %v334_v33  ;;  %504 = vmatpush.msra.mxu2 %v336_v20  ;;  %v550_v33 = vperm.slane %v1824_v1, 0  ;;  %v551_v20 = vperm.slane %v1824_v1, 1 }
 0x25b   :  { %533 = vmatpush.msra.mxu3 %v337_v41  ;;  %1816 = vmatmul.msk.f32.vlgmr.msra.gmra.mxu2 %vm418_vm9, %v414_v50 }
 0x25c   :  { %1820 = vmatmul.msk.f32.vlgmr.msra.gmra.mxu3 %vm418_vm9, %v414_v50  ;;  %1808 = vmatmul.msk.f32.vlgmr.msra.gmra.mxu0 %vm418_vm9, %v414_v50 }
 0x25d   :  { %1813 = vmatmul.msk.f32.gmra.mxu1 %vm418_vm9, %v415_v17 }
 0x263   :  { %1817 = vmatmul.msk.f32.gmra.mxu2 %vm418_vm9, %v415_v17 }
 0x264   :  { %1821 = vmatmul.msk.f32.gmra.mxu3 %vm418_vm9, %v415_v17  ;;  %1809 = vmatmul.msk.f32.gmra.mxu0 %vm418_vm9, %v415_v17 }
 0x265   :  { %1814 = vmatmul.msk.f32.gmra.mxu1 %vm418_vm9, %v416_v18 }
 0x26b   :  { %1818 = vmatmul.msk.f32.gmra.mxu2 %vm418_vm9, %v416_v18 }
 0x26c   :  { %1822 = vmatmul.msk.f32.gmra.mxu3 %vm418_vm9, %v416_v18  ;;  %1810 = vmatmul.msk.f32.gmra.mxu0 %vm418_vm9, %v416_v18 }
 0x26d   :  { %1815 = vmatmul.msk.f32.gmra.mxu1 %vm418_vm9, %v417_v44 }
 0x273   :  { %1819 = vmatmul.msk.f32.gmra.mxu2 %vm418_vm9, %v417_v44 }
 0x274   :  { %1823 = vmatmul.msk.f32.gmra.mxu3 %vm418_vm9, %v417_v44  ;;  %1811 = vmatmul.msk.f32.gmra.mxu0 %vm418_vm9, %v417_v44 }
 0x2d2   :  { %v2445_v19 = vpop.f32.mrf.mxu1 }
 0x2d3   :  { %v559_v25 = vmul.f32 %v551_v20, %v2445_v19 }
 0x2d5   :  { %v599_v24 = vmul.f32 %v559_v25, %v2445_v19 }
 0x2d9   :  { %v2447_v7 = vpop.f32.mrf.mxu0 }
 0x2da   :  { %v2449_v29 = vpop.f32.mrf.mxu1  ;;  %v558_v23 = vmul.f32 %v550_v33, %v2447_v7 }
 0x2db   :  { %v563_v34 = vmul.f32 %v551_v20, %v2449_v29 }
 0x2dc   :  { %v598_v4 = vmul.f32 %v558_v23, %v2447_v7 }
 0x2dd   :  { %v603_v42 = vmul.f32 %v563_v34, %v2449_v29 }
 0x2de   :  { %v2454_v30 = vpop.f32.mrf.mxu2 }
 0x2df   :  { %v2456_v3 = vpop.f32.mrf.mxu3  ;;  %v560_v28 = vmul.f32 %v552_v53, %v2454_v30 }
 0x2e1   :  { %v2458_v41 = vpop.f32.mrf.mxu0  ;;  %v600_v52 = vmul.f32 %v560_v28, %v2454_v30 }
 0x2e2   :  { %v562_v43 = vmul.f32 %v550_v33, %v2458_v41  ;;  %v2462_v32 = vpop.f32.mrf.mxu1 }
 0x2e3   :  { %v567_v63 = vmul.f32 %v551_v20, %v2462_v32 }
 0x2e4   :  { %v579_v54 = vadd.f32 %v563_v34, %v562_v43  ;;  %v602_v27 = vmul.f32 %v562_v43, %v2458_v41  ;;  %v561_v34 = vmul.f32 %v553_v56, %v2456_v3 }
 0x2e5   :  { %v607_v13 = vmul.f32 %v567_v63, %v2462_v32 }
 0x2e6   :  { %v2464_v55 = vpop.f32.mrf.mxu2 }
 0x2e7   :  { %v564_v57 = vmul.f32 %v552_v53, %v2464_v55  ;;  %v2467_v58 = vpop.f32.mrf.mxu3 }
 0x2e8   :  { %v565_v60 = vmul.f32 %v553_v56, %v2467_v58 }
 0x2e9   :  { %v2469_v59 = vpop.f32.mrf.mxu0  ;;  %v580_v61 = vadd.f32 %v579_v54, %v564_v57  ;;  %v604_v17 = vmul.f32 %v564_v57, %v2464_v55 }
 0x2ea   :  { %v566_v62 = vmul.f32 %v550_v33, %v2469_v59  ;;  %v2474_v0 = vpop.f32.mrf.mxu1 }
 0x2eb   :  { %v581_v46 = vadd.f32 %v580_v61, %v565_v60  ;;  %v571_v11 = vmul.f32 %v551_v20, %v2474_v0  ;;  %v574_v20 = vadd.f32 %v559_v25, %v558_v23 }
 0x2ec   :  { %v584_v10 = vadd.f32 %v567_v63, %v566_v62  ;;  %v606_v12 = vmul.f32 %v566_v62, %v2469_v59  ;;  %v601_v62 = vmul.f32 %v561_v34, %v2456_v3  ;;  %v605_v63 = vmul.f32 %v565_v60, %v2467_v58 }
 0x2ed   :  { %582 = vadd.xlane.f32.xlu1 %v581_v46  ;;  %v611_v9 = vmul.f32 %v571_v11, %v2474_v0  ;;  %v575_v46 = vadd.f32 %v574_v20, %v560_v28 }
 0x2ee   :  { %v2476_v40 = vpop.f32.mrf.mxu2  ;;  %v624_v31 = vadd.f32 %v607_v13, %v606_v12 }
 0x2ef   :  { %v568_v49 = vmul.f32 %v552_v53, %v2476_v40  ;;  %v2479_v8 = vpop.f32.mrf.mxu3 }
 0x2f0   :  { %v569_v15 = vmul.f32 %v553_v56, %v2479_v8 }
 0x2f1   :  { %v2484_v14 = vpop.f32.mrf.mxu0  ;;  %v585_v39 = vadd.f32 %v584_v10, %v568_v49  ;;  %v608_v21 = vmul.f32 %v568_v49, %v2476_v40  ;;  %v576_v49 = vadd.f32 %v575_v46, %v561_v34 }
 0x2f2   :  { %v570_v45 = vmul.f32 %v550_v33, %v2484_v14  ;;  %v609_v50 = vmul.f32 %v569_v15, %v2479_v8  ;;  %v614_v33 = vadd.f32 %v599_v24, %v598_v4 }
 0x2f3   :  { %v586_v22 = vadd.f32 %v585_v39, %v569_v15  ;;  %v625_v38 = vadd.f32 %v624_v31, %v608_v21 }
 0x2f4   :  { %v610_v16 = vmul.f32 %v570_v45, %v2484_v14  ;;  %v589_v5 = vadd.f32 %v571_v11, %v570_v45  ;;  %v615_v54 = vadd.f32 %v614_v33, %v600_v52 }
 0x2f5   :  { %587 = vadd.xlane.f32.xlu0 %v586_v22  ;;  %v626_v18 = vadd.f32 %v625_v38, %v609_v50 }
 0x2f6   :  { %v2494_v35 = vpop.f32.mrf.mxu2  ;;  %v629_v2 = vadd.f32 %v611_v9, %v610_v16  ;;  %v616_v57 = vadd.f32 %v615_v54, %v601_v62 }
 0x2f7   :  { %v572_v36 = vmul.f32 %v552_v53, %v2494_v35  ;;  %v2497_v37 = vpop.f32.mrf.mxu3  ;;  %v619_v53 = vadd.f32 %v603_v42, %v602_v27 }
 0x2f8   :  { %v573_v47 = vmul.f32 %v553_v56, %v2497_v37 }
 0x2f9   :  { %v612_v48 = vmul.f32 %v572_v36, %v2494_v35  ;;  %v590_v51 = vadd.f32 %v589_v5, %v572_v36  ;;  %v620_v61 = vadd.f32 %v619_v53, %v604_v17 }
 0x2fa   :  { %v613_v6 = vmul.f32 %v573_v47, %v2497_v37 }
 0x2fb   :  { %v591_v44 = vadd.f32 %v590_v51, %v573_v47  ;;  %v630_v1 = vadd.f32 %v629_v2, %v612_v48  ;;  %v621_v10 = vadd.f32 %v620_v61, %v605_v63  ;;  %v648_v61 = vld [vmem:[%s3636_s4 + $0x10] sm:$0xff] }
 0x2fd   :  { %627 = vadd.xlane.f32.xlu0 %v626_v18  ;;  %592 = vadd.xlane.f32.xlu1 %v591_v44  ;;  %v631_v43 = vadd.f32 %v630_v1, %v613_v6 }
 0x2ff   :  { %632 = vadd.xlane.f32.xlu2 %v631_v43 }
 0x305   :  { %617 = vadd.xlane.f32.xlu0 %v616_v57  ;;  %622 = vadd.xlane.f32.xlu1 %v621_v10 }
 0x307   :  { %577 = vadd.xlane.f32.xlu2 %v576_v49 }
 0x360   :  { %v583_v11 = vpop.xlane.xlu1 %582 }
 0x361   :  { %v2516_v25 = vmul.f32 0.0025510204, %v583_v11 }
 0x363   :  { %v639_v36 = vmul.f32 %v2516_v25, %v2516_v25 }
 0x368   :  { %v588_v56 = vpop.xlane.xlu0 %587 }
 0x369   :  { %v596_v12 = vmul.f32 0.0025510204, %v588_v56 }
 0x36b   :  { %v640_v39 = vmul.f32 %v596_v12, %v596_v12 }
 0x370   :  { %v628_v13 = vpop.xlane.xlu0 %627  ;;  %v593_v15 = vpop.xlane.xlu1 %592 }
 0x371   :  { %v636_v45 = vmul.f32 0.0025510204, %v628_v13  ;;  %v2512_v21 = vmul.f32 0.0025510204, %v593_v15  ;;  %v1827_v13 = vld [vmem:[%s3636_s4 + $0x30] sm:$0xff]  ;;  %v649_v15 = vld [vmem:[%s3636_s4 + $0x18] sm:$0xff] }
 0x372   :  { %v633_v9 = vpop.xlane.xlu2 %632 }
 0x373   :  { %v644_v22 = vsub.f32 %v636_v45, %v640_v39  ;;  %v641_v60 = vmul.f32 %v2512_v21, %v2512_v21  ;;  %v637_v23 = vmul.f32 0.0025510204, %v633_v9 }
 0x375   :  { %v652_v16 = vadd.f32 1e-05, %v644_v22  ;;  %v645_v31 = vsub.f32 %v637_v23, %v641_v60 }
 0x377   :  { %2025 = vrsqrt.f32 %v652_v16  ;;  %v653_v5 = vadd.f32 1e-05, %v645_v31  ;;  %vm680_vm11 = vweird.f32 %v652_v16  ;;  %v647_v31 = vld [vmem:[%s3636_s4 + $0x8] sm:$0xff] }
 0x378   :  { %v623_v28 = vpop.xlane.xlu1 %622  ;;  %v618_v2 = vpop.xlane.xlu0 %617 }
 0x379   :  { %2027 = vrsqrt.f32 %v653_v5  ;;  %v635_v38 = vmul.f32 0.0025510204, %v623_v28  ;;  %v634_v27 = vmul.f32 0.0025510204, %v618_v2  ;;  %vm690_vm14 = vweird.f32 %v653_v5  ;;  %v646_v2 = vld [vmem:[%s3636_s4] sm:$0xff] }
 0x37a   :  { %v578_v4 = vpop.xlane.xlu2 %577 }
 0x37b   :  { %v643_v24 = vsub.f32 %v635_v38, %v639_v36  ;;  %v2520_v42 = vmul.f32 0.0025510204, %v578_v4 }
 0x37d   :  { %v2026_v47 = vpop.eup %2025  ;;  %v651_v48 = vadd.f32 1e-05, %v643_v24  ;;  %v638_v50 = vmul.f32 %v2520_v42, %v2520_v42  ;;  %v1828_v24 = vld [vmem:[%s3636_s4 + $0x38] sm:$0xff] }
 0x37e   :  { %v675_v51 = vmul.f32 %v2026_v47, %v652_v16  ;;  %vm681_vm10 = vweird.f32 %v2026_v47 }
 0x37f   :  { %v2028_v52 = vpop.eup %2027  ;;  %2029 = vrsqrt.f32 %v651_v48  ;;  %v642_v6 = vsub.f32 %v634_v27, %v638_v50  ;;  %vm682_vm13 = vmor %vm680_vm11, %vm681_vm10  ;;  %vm670_vm4 = vweird.f32 %v651_v48 }
 0x380   :  { %v676_v17 = vmul.f32 %v2026_v47, %v675_v51  ;;  %v685_v18 = vmul.f32 %v2028_v52, %v653_v5  ;;  %vm691_vm12 = vweird.f32 %v2028_v52 }
 0x381   :  { %v650_v44 = vadd.f32 1e-05, %v642_v6  ;;  %vm692_vm15 = vmor %vm690_vm14, %vm691_vm12  ;;  %v1826_v6 = vld [vmem:[%s3636_s4 + $0x28] sm:$0xff] }
 0x382   :  { %v677_v1 = vmul.f32 0.5, %v676_v17  ;;  %v686_v33 = vmul.f32 %v2028_v52, %v685_v18 }
 0x383   :  { %2031 = vrsqrt.f32 %v650_v44  ;;  %vm660_vm7 = vweird.f32 %v650_v44 }
 0x384   :  { %v678_v20 = vsub.f32 1.5, %v677_v1  ;;  %v687_v34 = vmul.f32 0.5, %v686_v33 }
 0x385   :  { %v2030_v43 = vpop.eup %2029 }
 0x386   :  { %v688_v53 = vsub.f32 1.5, %v687_v34  ;;  %v665_v54 = vmul.f32 %v2030_v43, %v651_v48  ;;  %v679_v62 = vmul.f32 %v2026_v47, %v678_v20  ;;  %vm671_vm3 = vweird.f32 %v2030_v43 }
 0x387   :  { %vm672_vm5 = vmor %vm670_vm4, %vm671_vm3 }
 0x388   :  { %v689_v63 = vmul.f32 %v2028_v52, %v688_v53  ;;  %v666_v46 = vmul.f32 %v2030_v43, %v665_v54  ;;  %v683_v57 = vsel %vm682_vm13, %v2026_v47, %v679_v62 }
 0x389   :  { %v2032_v10 = vpop.eup %2031  ;;  %v696_v49 = vmul.f32 %v683_v57, %v648_v61 }
 0x38a   :  { %v667_v11 = vmul.f32 0.5, %v666_v46  ;;  %v655_v56 = vmul.f32 %v2032_v10, %v650_v44  ;;  %v693_v39 = vsel %vm692_vm15, %v2028_v52, %v689_v63  ;;  %vm661_vm6 = vweird.f32 %v2032_v10 }
 0x38b   :  { %723 = vperm.xlu1 %1838, %v696_v49   ;;  %v705_v45 = vmul.f32 %v696_v49, %v596_v12  ;;  %v697_v23 = vmul.f32 %v693_v39, %v649_v15  ;;  %vm662_vm8 = vmor %vm660_vm7, %vm661_vm6 }
 0x38c   :  { %v668_v9 = vsub.f32 1.5, %v667_v11  ;;  %v656_v22 = vmul.f32 %v2032_v10, %v655_v56 }
 0x38d   :  { %v709_v60 = vsub.f32 %v1827_v13, %v705_v45  ;;  %v706_v12 = vmul.f32 %v697_v23, %v2512_v21  ;;  %v1825_v21 = vld [vmem:[%s3636_s4 + $0x20] sm:$0xff] }
 0x38e   :  { %v657_v16 = vmul.f32 0.5, %v656_v22  ;;  %v669_v5 = vmul.f32 %v2030_v43, %v668_v9 }
 0x38f   :  { %759 = vperm.xlu0 %1840, %v709_v60   ;;  %v710_v48 = vsub.f32 %v1828_v24, %v706_v12 }
 0x390   :  { %v658_v28 = vsub.f32 1.5, %v657_v16  ;;  %v673_v36 = vsel %vm672_vm5, %v2030_v43, %v669_v5  ;;  %vm1794_vm5 = vcmask 11264  }
 0x391   :  { %v695_v38 = vmul.f32 %v673_v36, %v647_v31 }
 0x392   :  { %v659_v4 = vmul.f32 %v2032_v10, %v658_v28 }
 0x393   :  { %718 = vperm.xlu2 %1839, %v695_v38   ;;  %v704_v52 = vmul.f32 %v695_v38, %v2516_v25 }
 0x394   :  { %v663_v47 = vsel %vm662_vm8, %v2032_v10, %v659_v4 }
 0x395   :  { %v694_v27 = vmul.f32 %v663_v47, %v646_v2  ;;  %v708_v17 = vsub.f32 %v1826_v6, %v704_v52 }
 0x397   :  { %713 = vperm.xlu1 %1838, %v694_v27   ;;  %764 = vperm.xlu0 %1840, %v710_v48   ;;  %v703_v50 = vmul.f32 %v694_v27, %v2520_v42 }
 0x399   :  { %v707_v51 = vsub.f32 %v1825_v21, %v703_v50 }
 0x39b   :  { %728 = vperm.xlu2 %1839, %v697_v23  }
 0x39f   :  { %749 = vperm.xlu0 %1840, %v707_v51  }
 0x3a3   :  { %754 = vperm.xlu2 %1839, %v708_v17  }
 0x3ed   :  { %v2551_v18 = vpop.permute.xlu2 %718 }
 0x3ee   :  { %v735_v42 = vmul.f32 %v2551_v18, %v2458_v41  ;;  %v738_v1 = vmul.f32 %v2551_v18, %v2467_v58  ;;  %v736_v62 = vmul.f32 %v2551_v18, %v2449_v29  ;;  %v737_v51 = vmul.f32 %v2551_v18, %v2464_v55 }
 0x3f5   :  { %v2553_v44 = vpop.permute.xlu2 %728 }
 0x3f6   :  { %v745_v38 = vmul.f32 %v2553_v44, %v2494_v35  ;;  %v746_v12 = vmul.f32 %v2553_v44, %v2497_v37  ;;  %v744_v50 = vmul.f32 %v2553_v44, %v2474_v0 }
 0x3fd   :  { %v2559_v33 = vpop.permute.xlu2 %754  ;;  %v724_v54 = vpop.permute.xlu1 %723 }
 0x3fe   :  { %v2562_v25 = vadd.f32 %v2559_v33, %v735_v42  ;;  %v2565_v20 = vadd.f32 %v2559_v33, %v738_v1  ;;  %v2577_v63 = vadd.f32 %v2559_v33, %v736_v62  ;;  %v739_v15 = vmul.f32 %v724_v54, %v2469_v59 }
 0x3ff   :  { %v742_v29 = vmul.f32 %v724_v54, %v2479_v8  ;;  %v740_v16 = vmul.f32 %v724_v54, %v2462_v32  ;;  %v741_v2 = vmul.f32 %v724_v54, %v2476_v40  ;;  %v2669_v0 = vadd.f32 %v2559_v33, %v737_v51 }
 0x400   :  { %v787_v34 = vmax.f32 %v2562_v25, 0.0  ;;  %v790_v43 = vmax.f32 %v2565_v20, 0.0  ;;  %v788_v39 = vmax.f32 %v2577_v63, 0.0  ;;  %v945_v25 = vld [vmem:[%s3637_s5 + $0x10] sm:$0xff]  ;;  %v946_v20 = vld [vmem:[%s3637_s5 + $0x18] sm:$0xff] }
 0x401   :  { %v760_v53 = vpop.permute.xlu0 %759  ;;  %v789_v55 = vmax.f32 %v2669_v0, 0.0 }
 0x402   :  { %v1911_v41 = vpack.i.bf16 %v787_v34, %v790_v43  ;;  %v2596_v9 = vadd.f32 %v760_v53, %v742_v29  ;;  %v2619_v28 = vadd.f32 %v760_v53, %v740_v16  ;;  %v2643_v27 = vadd.f32 %v760_v53, %v741_v2 }
 0x404   :  { %1912 = vrot.lane.b32.xlu2 %v1911_v41, %s2044_s28  ;;  %v794_v60 = vmax.f32 %v2596_v9, 0.0  ;;  %v792_v32 = vmax.f32 %v2619_v28, 0.0  ;;  %v793_v48 = vmax.f32 %v2643_v27, 0.0  ;;  %v943_v9 = vld [vmem:[%s3637_s5] sm:$0xff] }
 0x409   :  { %v765_v58 = vpop.permute.xlu0 %764  ;;  %v714_v61 = vpop.permute.xlu1 %713 }
 0x40a   :  { %v731_v46 = vmul.f32 %v714_v61, %v2447_v7  ;;  %v732_v57 = vmul.f32 %v714_v61, %v2445_v19  ;;  %v734_v10 = vmul.f32 %v714_v61, %v2456_v3  ;;  %v2594_v3 = vadd.f32 %v760_v53, %v739_v15 }
 0x40b   :  { %v733_v23 = vmul.f32 %v714_v61, %v2454_v30  ;;  %v743_v30 = vmul.f32 %v2553_v44, %v2484_v14  ;;  %v2639_v47 = vadd.f32 %v765_v58, %v745_v38  ;;  %v2641_v14 = vadd.f32 %v765_v58, %v746_v12 }
 0x40c   :  { %v791_v8 = vmax.f32 %v2594_v3, 0.0  ;;  %v2660_v52 = vadd.f32 %v765_v58, %v744_v50 }
 0x40d   :  { %v2633_v4 = vadd.f32 %v765_v58, %v743_v30  ;;  %v797_v35 = vmax.f32 %v2639_v47, 0.0  ;;  %v798_v37 = vmax.f32 %v2641_v14, 0.0 }
 0x40e   :  { %v1946_v5 = vpack.i.bf16 %v791_v8, %v794_v60  ;;  %v796_v17 = vmax.f32 %v2660_v52, 0.0 }
 0x40f   :  { %v795_v40 = vmax.f32 %v2633_v4, 0.0  ;;  %v1961_v6 = vpack.i.bf16 %v798_v37, %v797_v35 }
 0x410   :  { %v1971_v18 = vpack.i.bf16 %v789_v55, %v796_v17 }
 0x411   :  { %v750_v49 = vpop.permute.xlu0 %749  ;;  %v1966_v21 = vpack.i.bf16 %v793_v48, %v795_v40 }
 0x412   :  { %v2582_v11 = vadd.f32 %v750_v49, %v731_v46  ;;  %v2584_v56 = vadd.f32 %v750_v49, %v732_v57  ;;  %v2586_v13 = vadd.f32 %v750_v49, %v734_v10  ;;  %v2613_v31 = vadd.f32 %v750_v49, %v733_v23 }
 0x414   :  { %v783_v45 = vmax.f32 %v2582_v11, 0.0  ;;  %v784_v7 = vmax.f32 %v2584_v56, 0.0  ;;  %v786_v19 = vmax.f32 %v2586_v13, 0.0  ;;  %v785_v36 = vmax.f32 %v2613_v31, 0.0 }
 0x416   :  { %v1926_v22 = vpack.i.bf16 %v784_v7, %v788_v39  ;;  %v1906_v59 = vpack.i.bf16 %v783_v45, %v786_v19  ;;  %v1951_v24 = vpack.i.bf16 %v785_v36, %v792_v32 }
 0x418   :  { %1927 = vrot.lane.b32.xlu2 %v1926_v22, %s2043_s24  ;;  %1907 = vrot.lane.b32.xlu0 %v1906_v59, %s2043_s24 }
 0x419   :  { %1902 = vrot.lane.b32.xlu1 %v1906_v59, %s2044_s28 }
 0x420   :  { %1947 = vrot.lane.b32.xlu2 %v1946_v5, %s2043_s24  ;;  %1917 = vrot.lane.b32.xlu0 %v1926_v22, %s2044_s28 }
 0x421   :  { %1922 = vrot.lane.b32.xlu1 %v1911_v41, %s2043_s24 }
 0x428   :  { %1952 = vrot.lane.b32.xlu2 %v1951_v24, %s2043_s24  ;;  %1932 = vrot.lane.b32.xlu0 %v1911_v41, %s2042_s23 }
 0x429   :  { %1957 = vrot.lane.b32.xlu1 %v1946_v5, %s2042_s23 }
 0x430   :  { %1967 = vrot.lane.b32.xlu2 %v1966_v21, %s2044_s28  ;;  %1937 = vrot.lane.b32.xlu0 %v1946_v5, %s2044_s28 }
 0x431   :  { %1962 = vrot.lane.b32.xlu1 %v1961_v6, %s2044_s28 }
 0x438   :  { %1977 = vrot.lane.b32.xlu2 %v1961_v6, %s2043_s24  ;;  %1942 = vrot.lane.b32.xlu0 %v1951_v24, %s2044_s28 }
 0x439   :  { %1972 = vrot.lane.b32.xlu1 %v1971_v18, %s2044_s28 }
 0x440   :  { %2007 = vrot.lane.b32.xlu2 %v1971_v18, %s2042_s23  ;;  %1987 = vrot.lane.b32.xlu0 %v1971_v18, %s2043_s24 }
 0x441   :  { %1982 = vrot.lane.b32.xlu1 %v1966_v21, %s2043_s24 }
 0x448   :  { %2012 = vrot.lane.b32.xlu2 %v1906_v59, %s2042_s23  ;;  %2002 = vrot.lane.b32.xlu0 %v1966_v21, %s2042_s23 }
 0x449   :  { %1992 = vrot.lane.b32.xlu1 %v1961_v6, %s2042_s23 }
 0x450   :  { %2017 = vrot.lane.b32.xlu0 %v1926_v22, %s2042_s23 }
 0x451   :  { %1997 = vrot.lane.b32.xlu1 %v1951_v24, %s2042_s23 }
 0x45e   :  { %v1913_v44 = vpop.permute.xlu2 %1912 }
 0x45f   :  { %v1915_v23 = vunpack.i.h.bf16 %v1913_v44  ;;  %v1914_v16 = vunpack.i.l.bf16 %v1913_v44 }
 0x461   :  { %v940_v6 = vsel %vm87_vm2, %v1914_v16, %v1915_v23 }
 0x472   :  { %v2689_v42 = vpop.permute.xlu2 %1927 }
 0x47a   :  { %v2695_v53 = vpop.permute.xlu2 %1947 }
 0x482   :  { %v2701_v58 = vpop.permute.xlu2 %1952 }
 0x48a   :  { %v2691_v1 = vpop.permute.xlu0 %1907  ;;  %v1968_v46 = vpop.permute.xlu2 %1967 }
 0x48b   :  { %v2693_v33 = vpop.permute.xlu1 %1902  ;;  %v1969_v10 = vunpack.i.l.bf16 %v1968_v46  ;;  %v1970_v5 = vunpack.i.h.bf16 %v1968_v46 }
 0x48c   :  { %v1905_v12 = vunpack.i.h.bf16 %v2693_v33  ;;  %v1904_v2 = vunpack.i.l.bf16 %v2693_v33 }
 0x48e   :  { %v939_v33 = vsel %vm87_vm2, %v1904_v2, %v1905_v12 }
 0x492   :  { %v2697_v41 = vpop.permute.xlu0 %1917  ;;  %v1978_v21 = vpop.permute.xlu2 %1977 }
 0x493   :  { %v2699_v54 = vpop.permute.xlu1 %1922 }
 0x49a   :  { %v2703_v61 = vpop.permute.xlu0 %1932 }
 0x49b   :  { %v2705_v62 = vpop.permute.xlu1 %1957 }
 0x4a2   :  { %v1938_v57 = vpop.permute.xlu0 %1937 }
 0x4a3   :  { %v1963_v49 = vpop.permute.xlu1 %1962  ;;  %v1940_v15 = vunpack.i.h.bf16 %v1938_v57  ;;  %v1939_v29 = vunpack.i.l.bf16 %v1938_v57 }
 0x4a4   :  { %v1965_v22 = vunpack.i.h.bf16 %v1963_v49  ;;  %v1964_v59 = vunpack.i.l.bf16 %v1963_v49 }
 0x4a5   :  { %v929_v24 = vsel %vm87_vm2, %v1970_v5, %v1939_v29  ;;  %v941_v50 = vsel %vm87_vm2, %v1939_v29, %v1940_v15 }
 0x4a6   :  { %v930_v30 = vsel %vm87_vm2, %v1964_v59, %v1965_v22  ;;  %v942_v38 = vsel %vm87_vm2, %v1965_v22, %v1969_v10  ;;  %v1919_v22 = vunpack.i.l.bf16 %v2697_v41 }
 0x4a7   :  { %1005 = vmatpush.msrb.mxu2 %v930_v30  ;;  %1034 = vmatpush.msrb.mxu3 %v942_v38 }
 0x4a9   :  { %1006 = vmatpush.msrb.mxu2 %v929_v24  ;;  %1035 = vmatpush.msrb.mxu3 %v941_v50  ;;  %v1980_v24 = vunpack.i.h.bf16 %v1978_v21  ;;  %v1979_v50 = vunpack.i.l.bf16 %v1978_v21  ;;  %v1949_v21 = vunpack.i.l.bf16 %v2695_v53 }
 0x4aa   :  { %v1943_v51 = vpop.permute.xlu0 %1942 }
 0x4ab   :  { %v1973_v18 = vpop.permute.xlu1 %1972  ;;  %1036 = vmatpush.msrb.mxu3 %v940_v6  ;;  %v1944_v44 = vunpack.i.l.bf16 %v1943_v51  ;;  %v1945_v49 = vunpack.i.h.bf16 %v1943_v51  ;;  %v1920_v6 = vunpack.i.h.bf16 %v2697_v41 }
 0x4ac   :  { %v1975_v46 = vunpack.i.h.bf16 %v1973_v18  ;;  %v1974_v57 = vunpack.i.l.bf16 %v1973_v18 }
 0x4ad   :  { %1037 = vmatpush.msrb.mxu3 %v939_v33  ;;  %v937_v51 = vsel %vm87_vm2, %v1940_v15, %v1944_v44  ;;  %v933_v18 = vsel %vm87_vm2, %v1944_v44, %v1970_v5  ;;  %v1954_v15 = vunpack.i.l.bf16 %v2701_v58  ;;  %v882_v5 = vsel %vm74_vm1, %v1979_v50, %v1980_v24 }
 0x4ae   :  { %v938_v29 = vsel %vm87_vm2, %v1969_v10, %v1974_v57  ;;  %v934_v30 = vsel %vm87_vm2, %v1974_v57, %v1964_v59  ;;  %v928_v38 = vsel %vm87_vm2, %v1975_v46, %v1914_v16  ;;  %v927_v10 = vsel %vm87_vm2, %v1945_v49, %v1904_v2  ;;  %v2743_v2 = vpop.permute.xlu2 %2007 }
 0x4af   :  { %947 = vmatpush.msrb.mxu0 %v938_v29  ;;  %976 = vmatpush.msrb.mxu1 %v934_v30  ;;  %v936_v16 = vsel %vm87_vm2, %v1915_v23, %v1919_v22  ;;  %v932_v41 = vsel %vm87_vm2, %v1919_v22, %v1975_v46  ;;  %v935_v23 = vsel %vm87_vm2, %v1905_v12, %v1920_v6  ;;  %v1950_v22 = vunpack.i.h.bf16 %v2695_v53 }
 0x4b0   :  { %1007 = vmatpush.msrb.mxu2 %v928_v38  ;;  %v931_v46 = vsel %vm87_vm2, %v1920_v6, %v1945_v49  ;;  %v1955_v30 = vunpack.i.h.bf16 %v2701_v58  ;;  %v1930_v53 = vunpack.i.h.bf16 %v2689_v42  ;;  %v1909_v58 = vunpack.i.l.bf16 %v2691_v1 }
 0x4b1   :  { %948 = vmatpush.msrb.mxu0 %v937_v51  ;;  %977 = vmatpush.msrb.mxu1 %v933_v18  ;;  %v1925_v18 = vunpack.i.h.bf16 %v2699_v54  ;;  %v1924_v6 = vunpack.i.l.bf16 %v2699_v54  ;;  %v893_v54 = vsel %vm74_vm1, %v1949_v21, %v1950_v22 }
 0x4b2   :  { %1008 = vmatpush.msrb.mxu2 %v927_v10  ;;  %v1988_v59 = vpop.permute.xlu0 %1987 }
 0x4b3   :  { %v1989_v57 = vunpack.i.l.bf16 %v1988_v59  ;;  %v1983_v33 = vpop.permute.xlu1 %1982  ;;  %949 = vmatpush.msrb.mxu0 %v936_v16  ;;  %978 = vmatpush.msrb.mxu1 %v932_v41  ;;  %v1990_v38 = vunpack.i.h.bf16 %v1988_v59  ;;  %v1910_v59 = vunpack.i.h.bf16 %v2691_v1  ;;  %v889_v16 = vsel %vm74_vm1, %v1950_v22, %v1954_v15 }
 0x4b4   :  { %v1985_v44 = vunpack.i.h.bf16 %v1983_v33  ;;  %v1984_v29 = vunpack.i.l.bf16 %v1983_v33  ;;  %1009 = vmatpush.msrb.mxu2 %v882_v5  ;;  %v2009_v33 = vunpack.i.l.bf16 %v2743_v2 }
 0x4b5   :  { %950 = vmatpush.msrb.mxu0 %v935_v23  ;;  %979 = vmatpush.msrb.mxu1 %v931_v46  ;;  %v886_v51 = vsel %vm74_vm1, %v1989_v57, %v1979_v50  ;;  %v1929_v50 = vunpack.i.l.bf16 %v2689_v42  ;;  %v880_v41 = vsel %vm74_vm1, %v1990_v38, %v1924_v6  ;;  %v887_v22 = vsel %vm74_vm1, %v1910_v59, %v1930_v53 }
 0x4b6   :  { %v890_v10 = vsel %vm74_vm1, %v1984_v29, %v1989_v57  ;;  %v881_v12 = vsel %vm74_vm1, %v1985_v44, %v1949_v21  ;;  %v894_v49 = vsel %vm74_vm1, %v1980_v24, %v1984_v29  ;;  %v885_v24 = vsel %vm74_vm1, %v1954_v15, %v1985_v44 }
 0x4b7   :  { %951 = vmatpush.msrb.mxu0 %v890_v10  ;;  %980 = vmatpush.msrb.mxu1 %v886_v51  ;;  %v888_v1 = vsel %vm74_vm1, %v1925_v18, %v1929_v50  ;;  %v884_v57 = vsel %vm74_vm1, %v1929_v50, %v1990_v38  ;;  %v883_v15 = vsel %vm74_vm1, %v1930_v53, %v1955_v30  ;;  %v1960_v51 = vunpack.i.h.bf16 %v2705_v62 }
 0x4b8   :  { %1010 = vmatpush.msrb.mxu2 %v881_v12  ;;  %1038 = vmatpush.msrb.mxu3 %v894_v49  ;;  %v879_v21 = vsel %vm74_vm1, %v1955_v30, %v1909_v58  ;;  %v892_v29 = vsel %vm74_vm1, %v1924_v6, %v1925_v18  ;;  %v891_v38 = vsel %vm74_vm1, %v1909_v58, %v1910_v59  ;;  %v1959_v10 = vunpack.i.l.bf16 %v2705_v62  ;;  %v2013_v18 = vpop.permute.xlu2 %2012 }
 0x4b9   :  { %952 = vmatpush.msrb.mxu0 %v889_v16  ;;  %981 = vmatpush.msrb.mxu1 %v885_v24  ;;  %v2010_v6 = vunpack.i.h.bf16 %v2743_v2  ;;  %v1935_v62 = vunpack.i.h.bf16 %v2703_v61  ;;  %v1934_v50 = vunpack.i.l.bf16 %v2703_v61  ;;  %v2015_v59 = vunpack.i.h.bf16 %v2013_v18 }
 0x4ba   :  { %1011 = vmatpush.msrb.mxu2 %v880_v41  ;;  %1039 = vmatpush.msrb.mxu3 %v893_v54  ;;  %v2003_v42 = vpop.permute.xlu0 %2002  ;;  %v2014_v16 = vunpack.i.l.bf16 %v2013_v18  ;;  %v845_v41 = vsel %vm61_vm0, %v1959_v10, %v1960_v51 }
 0x4bb   :  { %v2004_v5 = vunpack.i.l.bf16 %v2003_v42  ;;  %v1993_v44 = vpop.permute.xlu1 %1992  ;;  %953 = vmatpush.msrb.mxu0 %v888_v1  ;;  %982 = vmatpush.msrb.mxu1 %v884_v57  ;;  %v2005_v12 = vunpack.i.h.bf16 %v2003_v42  ;;  %v832_v42 = vsel %vm61_vm0, %v2010_v6, %v1934_v50  ;;  %v844_v61 = vsel %vm61_vm0, %v1934_v50, %v1935_v62 }
 0x4bc   :  { %v1995_v23 = vunpack.i.h.bf16 %v1993_v44  ;;  %v1994_v46 = vunpack.i.l.bf16 %v1993_v44  ;;  %1012 = vmatpush.msrb.mxu2 %v879_v21  ;;  %1040 = vmatpush.msrb.mxu3 %v892_v29 }
 0x4bd   :  { %954 = vmatpush.msrb.mxu0 %v887_v22  ;;  %983 = vmatpush.msrb.mxu1 %v883_v15  ;;  %v842_v30 = vsel %vm61_vm0, %v2004_v5, %v2009_v33  ;;  %v833_v24 = vsel %vm61_vm0, %v2005_v12, %v1959_v10 }
 0x4be   :  { %1041 = vmatpush.msrb.mxu3 %v891_v38  ;;  %v838_v49 = vsel %vm61_vm0, %v2009_v33, %v1994_v46  ;;  %v834_v53 = vsel %vm61_vm0, %v1994_v46, %v1995_v23  ;;  %v846_v58 = vsel %vm61_vm0, %v1995_v23, %v2004_v5  ;;  %v843_v33 = vsel %vm61_vm0, %v2014_v16, %v2015_v59 }
 0x4bf   :  { %955 = vmatpush.msrb.mxu0 %v842_v30  ;;  %984 = vmatpush.msrb.mxu1 %v838_v49 }
 0x4c0   :  { %1013 = vmatpush.msrb.mxu2 %v834_v53  ;;  %1042 = vmatpush.msrb.mxu3 %v846_v58 }
 0x4c2   :  { %1014 = vmatpush.msrb.mxu2 %v833_v24  ;;  %1043 = vmatpush.msrb.mxu3 %v845_v41  ;;  %v2018_v54 = vpop.permute.xlu0 %2017 }
 0x4c3   :  { %v1998_v2 = vpop.permute.xlu1 %1997  ;;  %v2019_v1 = vunpack.i.l.bf16 %v2018_v54  ;;  %v2020_v5 = vunpack.i.h.bf16 %v2018_v54 }
 0x4c4   :  { %v2000_v57 = vunpack.i.h.bf16 %v1998_v2  ;;  %v1999_v15 = vunpack.i.l.bf16 %v1998_v2  ;;  %1015 = vmatpush.msrb.mxu2 %v832_v42  ;;  %1044 = vmatpush.msrb.mxu3 %v844_v61 }
 0x4c5   :  { %v840_v23 = vsel %vm61_vm0, %v1935_v62, %v2019_v1  ;;  %v836_v46 = vsel %vm61_vm0, %v2019_v1, %v2010_v6  ;;  %v839_v22 = vsel %vm61_vm0, %v2015_v59, %v2020_v5 }
 0x4c6   :  { %1045 = vmatpush.msrb.mxu3 %v843_v33  ;;  %v841_v44 = vsel %vm61_vm0, %v1960_v51, %v1999_v15  ;;  %v837_v21 = vsel %vm61_vm0, %v1999_v15, %v2005_v12  ;;  %v831_v29 = vsel %vm61_vm0, %v2000_v57, %v2014_v16  ;;  %v835_v14 = vsel %vm61_vm0, %v2020_v5, %v2000_v57 }
 0x4c7   :  { %956 = vmatpush.msrb.mxu0 %v841_v44  ;;  %985 = vmatpush.msrb.mxu1 %v837_v21 }
 0x4c8   :  { %1016 = vmatpush.msrb.mxu2 %v831_v29  ;;  %1046 = vmatpush.msrb.mxu3 %v798_v37 }
 0x4c9   :  { %957 = vmatpush.msrb.mxu0 %v840_v23  ;;  %986 = vmatpush.msrb.mxu1 %v836_v46 }
 0x4ca   :  { %1017 = vmatpush.msrb.mxu2 %v797_v35  ;;  %1047 = vmatpush.msrb.mxu3 %v794_v60 }
 0x4cb   :  { %958 = vmatpush.msrb.mxu0 %v839_v22  ;;  %987 = vmatpush.msrb.mxu1 %v835_v14 }
 0x4cc   :  { %1018 = vmatpush.msrb.mxu2 %v793_v48  ;;  %1048 = vmatpush.msrb.mxu3 %v790_v43 }
 0x4cd   :  { %959 = vmatpush.msrb.mxu0 %v795_v40  ;;  %988 = vmatpush.msrb.mxu1 %v796_v17 }
 0x4ce   :  { %1019 = vmatpush.msrb.mxu2 %v789_v55  ;;  %1049 = vmatpush.msrb.mxu3 %v786_v19 }
 0x4cf   :  { %960 = vmatpush.msrb.mxu0 %v791_v8  ;;  %989 = vmatpush.msrb.mxu1 %v792_v32 }
 0x4d0   :  { %1020 = vmatpush.msrb.mxu2 %v785_v36  ;;  %1050 = vmatmul.f32.vlgmr.msrb.gmra.mxu3 %v943_v9 }
 0x4d1   :  { %1021 = vmatmul.f32.vlgmr.msrb.gmra.mxu2 %v943_v9  ;;  %961 = vmatpush.msrb.mxu0 %v787_v34  ;;  %v1829_v34 = vld [vmem:[%s3633_s7 + $0x8] sm:$0xf] }
 0x4d2   :  { %990 = vmatpush.msrb.mxu1 %v788_v39  ;;  %v1066_v43 = vperm.slane %v1829_v34, 0  ;;  %v2872_v63 = vperm.slane %v1829_v34, 1  ;;  %v2876_v56 = vperm.slane %v1829_v34, 2  ;;  %v2878_v13 = vperm.slane %v1829_v34, 3 }
 0x4d3   :  { %962 = vmatpush.msrb.mxu0 %v783_v45 }
 0x4d4   :  { %991 = vmatpush.msrb.mxu1 %v784_v7  ;;  %963 = vmatmul.f32.vlgmr.msrb.gmra.mxu0 %v943_v9 }
 0x4d5   :  { %992 = vmatmul.f32.vlgmr.msrb.gmra.mxu1 %v943_v9 }
 0x4d8   :  { %1053 = vmatmul.f32.gmra.mxu3 %v944_v26 }
 0x4d9   :  { %1024 = vmatmul.f32.gmra.mxu2 %v944_v26 }
 0x4dc   :  { %966 = vmatmul.f32.gmra.mxu0 %v944_v26 }
 0x4dd   :  { %995 = vmatmul.f32.gmra.mxu1 %v944_v26 }
 0x4e0   :  { %1056 = vmatmul.f32.gmra.mxu3 %v945_v25 }
 0x4e1   :  { %1027 = vmatmul.f32.gmra.mxu2 %v945_v25 }
 0x4e4   :  { %969 = vmatmul.f32.gmra.mxu0 %v945_v25 }
 0x4e5   :  { %998 = vmatmul.f32.gmra.mxu1 %v945_v25 }
 0x4e8   :  { %1059 = vmatmul.f32.gmra.mxu3 %v946_v20 }
 0x4e9   :  { %1030 = vmatmul.f32.gmra.mxu2 %v946_v20 }
 0x4ec   :  { %972 = vmatmul.f32.gmra.mxu0 %v946_v20 }
 0x4ed   :  { %1001 = vmatmul.f32.gmra.mxu1 %v946_v20 }
 0x551   :  { %v2874_v11 = vpop.f32.mrf.mxu0 }
 0x552   :  { %v1074_v39 = vmul.f32 %v1066_v43, %v2874_v11  ;;  %v2881_v45 = vpop.f32.mrf.mxu1 }
 0x553   :  { %v1075_v7 = vmul.f32 %v2872_v63, %v2881_v45  ;;  %v2885_v19 = vpop.f32.mrf.mxu3 }
 0x554   :  { %v1114_v3 = vmul.f32 %v1074_v39, %v2874_v11  ;;  %v2888_v8 = vpop.f32.mrf.mxu2  ;;  %v1077_v28 = vmul.f32 %v2878_v13, %v2885_v19 }
 0x555   :  { %v1115_v60 = vmul.f32 %v1075_v7, %v2881_v45  ;;  %v1076_v31 = vmul.f32 %v2876_v56, %v2888_v8  ;;  %v1090_v36 = vadd.f32 %v1075_v7, %v1074_v39 }
 0x556   :  { %v1117_v35 = vmul.f32 %v1077_v28, %v2885_v19 }
 0x557   :  { %v1116_v32 = vmul.f32 %v1076_v31, %v2888_v8  ;;  %v1091_v4 = vadd.f32 %v1090_v36, %v1076_v31  ;;  %v1130_v47 = vadd.f32 %v1115_v60, %v1114_v3 }
 0x559   :  { %v2896_v27 = vpop.f32.mrf.mxu0  ;;  %v1092_v40 = vadd.f32 %v1091_v4, %v1077_v28  ;;  %v1131_v37 = vadd.f32 %v1130_v47, %v1116_v32 }
 0x55a   :  { %v1078_v48 = vmul.f32 %v1066_v43, %v2896_v27  ;;  %v2900_v52 = vpop.f32.mrf.mxu1 }
 0x55b   :  { %v1079_v0 = vmul.f32 %v2872_v63, %v2900_v52  ;;  %1093 = vadd.xlane.f32.xlu1 %v1092_v40  ;;  %v2904_v17 = vpop.f32.mrf.mxu3  ;;  %v1132_v55 = vadd.f32 %v1131_v37, %v1117_v35 }
 0x55c   :  { %v1118_v38 = vmul.f32 %v1078_v48, %v2896_v27  ;;  %v2907_v51 = vpop.f32.mrf.mxu2  ;;  %v1081_v30 = vmul.f32 %v2878_v13, %v2904_v17 }
 0x55d   :  { %v1119_v10 = vmul.f32 %v1079_v0, %v2900_v52  ;;  %v1080_v12 = vmul.f32 %v2876_v56, %v2907_v51  ;;  %1133 = vadd.xlane.f32.xlu2 %v1132_v55  ;;  %v1095_v18 = vadd.f32 %v1079_v0, %v1078_v48 }
 0x55e   :  { %v1121_v50 = vmul.f32 %v1081_v30, %v2904_v17 }
 0x55f   :  { %v1120_v49 = vmul.f32 %v1080_v12, %v2907_v51  ;;  %v1096_v53 = vadd.f32 %v1095_v18, %v1080_v12  ;;  %v1135_v58 = vadd.f32 %v1119_v10, %v1118_v38 }
 0x561   :  { %v2915_v6 = vpop.f32.mrf.mxu0  ;;  %v1097_v62 = vadd.f32 %v1096_v53, %v1081_v30  ;;  %v1136_v59 = vadd.f32 %v1135_v58, %v1120_v49 }
 0x562   :  { %v1082_v16 = vmul.f32 %v1066_v43, %v2915_v6  ;;  %v2919_v24 = vpop.f32.mrf.mxu1 }
 0x563   :  { %v1083_v41 = vmul.f32 %v2872_v63, %v2919_v24  ;;  %1098 = vadd.xlane.f32.xlu0 %v1097_v62  ;;  %v2923_v54 = vpop.f32.mrf.mxu3  ;;  %v1137_v2 = vadd.f32 %v1136_v59, %v1121_v50 }
 0x564   :  { %v1122_v42 = vmul.f32 %v1082_v16, %v2915_v6  ;;  %v2926_v61 = vpop.f32.mrf.mxu2  ;;  %v1085_v15 = vmul.f32 %v2878_v13, %v2923_v54 }
 0x565   :  { %v1123_v1 = vmul.f32 %v1083_v41, %v2919_v24  ;;  %v1084_v57 = vmul.f32 %v2876_v56, %v2926_v61  ;;  %1138 = vadd.xlane.f32.xlu1 %v1137_v2  ;;  %v1100_v33 = vadd.f32 %v1083_v41, %v1082_v16 }
 0x566   :  { %v1125_v46 = vmul.f32 %v1085_v15, %v2923_v54 }
 0x567   :  { %v1124_v5 = vmul.f32 %v1084_v57, %v2926_v61  ;;  %v1101_v44 = vadd.f32 %v1100_v33, %v1084_v57  ;;  %v1140_v21 = vadd.f32 %v1123_v1, %v1122_v42 }
 0x569   :  { %v2934_v29 = vpop.f32.mrf.mxu0  ;;  %v1102_v23 = vadd.f32 %v1101_v44, %v1085_v15  ;;  %v1141_v22 = vadd.f32 %v1140_v21, %v1124_v5  ;;  %v1162_v21 = vld [vmem:[%s3638_s6] sm:$0xff] }
 0x56a   :  { %v1086_v14 = vmul.f32 %v1066_v43, %v2934_v29  ;;  %v2938_v9 = vpop.f32.mrf.mxu1 }
 0x56b   :  { %v1087_v26 = vmul.f32 %v2872_v63, %v2938_v9  ;;  %1103 = vadd.xlane.f32.xlu2 %v1102_v23  ;;  %v2942_v25 = vpop.f32.mrf.mxu3  ;;  %v1142_v20 = vadd.f32 %v1141_v22, %v1125_v46  ;;  %v1458_v22 = vld [vmem:[%s3639_s10 + $0x78] sm:$0xff] }
 0x56c   :  { %v1126_v34 = vmul.f32 %v1086_v14, %v2934_v29  ;;  %v2945_v39 = vpop.f32.mrf.mxu2  ;;  %v1089_v43 = vmul.f32 %v2878_v13, %v2942_v25  ;;  %1507 = vmatpush.msra.mxu0 %v1458_v22 }
 0x56d   :  { %v1127_v7 = vmul.f32 %v1087_v26, %v2938_v9  ;;  %v1088_v3 = vmul.f32 %v2876_v56, %v2945_v39  ;;  %1143 = vadd.xlane.f32.xlu0 %v1142_v20  ;;  %v1105_v60 = vadd.f32 %v1087_v26, %v1086_v14  ;;  %v1474_v14 = vld [vmem:[%s3639_s10 + $0xf8] sm:$0xff] }
 0x56e   :  { %v1129_v32 = vmul.f32 %v1089_v43, %v2942_v25  ;;  %1572 = vmatpush.msra.mxu1 %v1474_v14 }
 0x56f   :  { %v1128_v63 = vmul.f32 %v1088_v3, %v2945_v39  ;;  %v1106_v31 = vadd.f32 %v1105_v60, %v1088_v3  ;;  %v1145_v28 = vadd.f32 %v1127_v7, %v1126_v34  ;;  %v1830_v7 = vld [vmem:[%s3638_s6 + $0x20] sm:$0xff]  ;;  %v1490_v3 = vld [vmem:[%s3639_s10 + $0x178] sm:$0xff]  ;;  %v1457_v60 = vld [vmem:[%s3639_s10 + $0x70] sm:$0xff] }
 0x570   :  { %1637 = vmatpush.msra.mxu2 %v1490_v3  ;;  %1508 = vmatpush.msra.mxu0 %v1457_v60  ;;  %v1768_v60 = vld [vmem:[%s3640_s9] sm:$0xf] }
 0x571   :  { %v1107_v36 = vadd.f32 %v1106_v31, %v1089_v43  ;;  %v1146_v4 = vadd.f32 %v1145_v28, %v1128_v63  ;;  %v1506_v43 = vld [vmem:[%s3639_s10 + $0x1f8] sm:$0xff] }
 0x572   :  { %1702 = vmatpush.msra.mxu3 %v1506_v43  ;;  %v1833_v43 = vld [vmem:[%s3638_s6 + $0x38] sm:$0xff] }
 0x573   :  { %1108 = vadd.xlane.f32.xlu1 %v1107_v36  ;;  %v1147_v47 = vadd.f32 %v1146_v4, %v1129_v32  ;;  %v1473_v36 = vld [vmem:[%s3639_s10 + $0xf0] sm:$0xff] }
 0x574   :  { %v1489_v32 = vld [vmem:[%s3639_s10 + $0x170] sm:$0xff]  ;;  %1573 = vmatpush.msra.mxu1 %v1473_v36  ;;  %v1487_v36 = vld [vmem:[%s3639_s10 + $0x160] sm:$0xff] }
 0x575   :  { %1148 = vadd.xlane.f32.xlu2 %v1147_v47  ;;  %v1505_v4 = vld [vmem:[%s3639_s10 + $0x1f0] sm:$0xff]  ;;  %1638 = vmatpush.msra.mxu2 %v1489_v32  ;;  %v1454_v32 = vld [vmem:[%s3639_s10 + $0x58] sm:$0xff] }
 0x576   :  { %1703 = vmatpush.msra.mxu3 %v1505_v4  ;;  %v1470_v4 = vld [vmem:[%s3639_s10 + $0xd8] sm:$0xff] }
 0x5ce   :  { %v1094_v40 = vpop.xlane.xlu1 %1093 }
 0x5cf   :  { %v2954_v35 = vmul.f32 0.00295858, %v1094_v40  ;;  %v1456_v40 = vld [vmem:[%s3639_s10 + $0x68] sm:$0xff] }
 0x5d0   :  { %v1134_v56 = vpop.xlane.xlu2 %1133  ;;  %1509 = vmatpush.msra.mxu0 %v1456_v40  ;;  %v1502_v40 = vld [vmem:[%s3639_s10 + $0x1d8] sm:$0xff] }
 0x5d1   :  { %v1154_v37 = vmul.f32 %v2954_v35, %v2954_v35  ;;  %v1150_v13 = vmul.f32 0.00295858, %v1134_v56  ;;  %v1472_v56 = vld [vmem:[%s3639_s10 + $0xe8] sm:$0xff] }
 0x5d2   :  { %1574 = vmatpush.msra.mxu1 %v1472_v56  ;;  %v1453_v56 = vld [vmem:[%s3639_s10 + $0x50] sm:$0xff] }
 0x5d3   :  { %v1158_v48 = vsub.f32 %v1150_v13, %v1154_v37  ;;  %v1488_v37 = vld [vmem:[%s3639_s10 + $0x168] sm:$0xff] }
 0x5d4   :  { %1639 = vmatpush.msra.mxu2 %v1488_v37  ;;  %v1469_v37 = vld [vmem:[%s3639_s10 + $0xd0] sm:$0xff] }
 0x5d5   :  { %v1166_v0 = vadd.f32 1e-05, %v1158_v48 }
 0x5d6   :  { %v1099_v55 = vpop.xlane.xlu0 %1098  ;;  %1640 = vmatpush.msra.mxu2 %v1487_v36  ;;  %v1475_v36 = vld [vmem:[%s3639_s10 + $0x100] sm:$0xff] }
 0x5d7   :  { %2033 = vrsqrt.f32 %v1166_v0  ;;  %v2958_v38 = vmul.f32 0.00295858, %v1099_v55  ;;  %vm1176_vm1 = vweird.f32 %v1166_v0 }
 0x5d8   :  { %v1139_v10 = vpop.xlane.xlu1 %1138 }
 0x5d9   :  { %v1155_v12 = vmul.f32 %v2958_v38, %v2958_v38  ;;  %v1151_v30 = vmul.f32 0.00295858, %v1139_v10 }
 0x5db   :  { %v1159_v18 = vsub.f32 %v1151_v30, %v1155_v12 }
 0x5dd   :  { %v2034_v49 = vpop.eup %2033  ;;  %v2962_v53 = vadd.f32 1e-05, %v1159_v18 }
 0x5de   :  { %v1171_v58 = vmul.f32 %v2034_v49, %v1166_v0  ;;  %v1104_v62 = vpop.xlane.xlu2 %1103  ;;  %vm1177_vm0 = vweird.f32 %v2034_v49  ;;  %v1504_v0 = vld [vmem:[%s3639_s10 + $0x1e8] sm:$0xff] }
 0x5df   :  { %2035 = vrsqrt.f32 %v2962_v53  ;;  %v2965_v50 = vmul.f32 0.00295858, %v1104_v62  ;;  %vm1178_vm2 = vmor %vm1176_vm1, %vm1177_vm0  ;;  %vm1186_vm10 = vweird.f32 %v2962_v53  ;;  %1704 = vmatpush.msra.mxu3 %v1504_v0  ;;  %v1452_v0 = vld [vmem:[%s3639_s10 + $0x48] sm:$0xff] }
 0x5e0   :  { %v1172_v59 = vmul.f32 %v2034_v49, %v1171_v58  ;;  %v1144_v16 = vpop.xlane.xlu0 %1143 }
 0x5e1   :  { %v1156_v41 = vmul.f32 %v2965_v50, %v2965_v50  ;;  %v1152_v2 = vmul.f32 0.00295858, %v1144_v16 }
 0x5e2   :  { %v1173_v42 = vmul.f32 0.5, %v1172_v59 }
 0x5e3   :  { %v1160_v1 = vsub.f32 %v1152_v2, %v1156_v41 }
 0x5e4   :  { %v1174_v57 = vsub.f32 1.5, %v1173_v42 }
 0x5e5   :  { %v2036_v15 = vpop.eup %2035  ;;  %v2969_v33 = vadd.f32 1e-05, %v1160_v1 }
 0x5e6   :  { %v1181_v5 = vmul.f32 %v2036_v15, %v2962_v53  ;;  %v1109_v44 = vpop.xlane.xlu1 %1108  ;;  %v1175_v23 = vmul.f32 %v2034_v49, %v1174_v57  ;;  %vm1187_vm9 = vweird.f32 %v2036_v15  ;;  %v1831_v53 = vld [vmem:[%s3638_s6 + $0x28] sm:$0xff] }
 0x5e7   :  { %2037 = vrsqrt.f32 %v2969_v33  ;;  %v2976_v46 = vmul.f32 0.00295858, %v1109_v44  ;;  %vm1188_vm11 = vmor %vm1186_vm10, %vm1187_vm9  ;;  %vm1196_vm13 = vweird.f32 %v2969_v33 }
 0x5e8   :  { %v1182_v26 = vmul.f32 %v2036_v15, %v1181_v5  ;;  %v1149_v20 = vpop.xlane.xlu2 %1148  ;;  %v1179_v34 = vsel %vm1178_vm2, %v2034_v49, %v1175_v23 }
 0x5e9   :  { %v1157_v63 = vmul.f32 %v2976_v46, %v2976_v46  ;;  %v1153_v31 = vmul.f32 0.00295858, %v1149_v20  ;;  %v1210_v28 = vmul.f32 %v1179_v34, %v1162_v21  ;;  %v1165_v20 = vld [vmem:[%s3638_s6 + $0x18] sm:$0xff] }
 0x5ea   :  { %v1183_v47 = vmul.f32 0.5, %v1182_v26 }
 0x5eb   :  { %v1161_v13 = vsub.f32 %v1153_v31, %v1157_v63  ;;  %1229 = vperm.xlu0 %1840, %v1210_v28   ;;  %v1219_v48 = vmul.f32 %v1210_v28, %v2954_v35  ;;  %v1163_v35 = vld [vmem:[%s3638_s6 + $0x8] sm:$0xff]  ;;  %v1455_v31 = vld [vmem:[%s3639_s10 + $0x60] sm:$0xff] }
 0x5ec   :  { %v1184_v55 = vsub.f32 1.5, %v1183_v47  ;;  %v1471_v28 = vld [vmem:[%s3639_s10 + $0xe0] sm:$0xff]  ;;  %1510 = vmatpush.msra.mxu0 %v1455_v31  ;;  %v1486_v47 = vld [vmem:[%s3639_s10 + $0x158] sm:$0xff] }
 0x5ed   :  { %v2038_v10 = vpop.eup %2037  ;;  %v1169_v12 = vadd.f32 1e-05, %v1161_v13  ;;  %v1223_v30 = vsub.f32 %v1830_v7, %v1219_v48  ;;  %1575 = vmatpush.msra.mxu1 %v1471_v28  ;;  %v1485_v13 = vld [vmem:[%s3639_s10 + $0x150] sm:$0xff]  ;;  %1641 = vmatpush.msra.mxu2 %v1486_v47  ;;  %v1443_v31 = vld [vmem:[%s3639_s10] sm:$0xff] }
 0x5ee   :  { %v1191_v18 = vmul.f32 %v2038_v10, %v2969_v33  ;;  %v1185_v49 = vmul.f32 %v2036_v15, %v1184_v55  ;;  %vm1197_vm12 = vweird.f32 %v2038_v10  ;;  %1511 = vmatpush.msra.mxu0 %v1454_v32  ;;  %v1501_v48 = vld [vmem:[%s3639_s10 + $0x1d0] sm:$0xff]  ;;  %v1468_v55 = vld [vmem:[%s3639_s10 + $0xc8] sm:$0xff]  ;;  %v1459_v28 = vld [vmem:[%s3639_s10 + $0x80] sm:$0xff] }
 0x5ef   :  { %2039 = vrsqrt.f32 %v1169_v12  ;;  %1265 = vperm.xlu1 %1838, %v1223_v30   ;;  %vm1198_vm14 = vmor %vm1196_vm13, %vm1197_vm12  ;;  %vm1206_vm3 = vweird.f32 %v1169_v12  ;;  %1576 = vmatpush.msra.mxu1 %v1470_v4  ;;  %v1451_v30 = vld [vmem:[%s3639_s10 + $0x40] sm:$0xff] }
 0x5f0   :  { %v1192_v58 = vmul.f32 %v2038_v10, %v1191_v18  ;;  %v1189_v62 = vsel %vm1188_vm11, %v2036_v15, %v1185_v49  ;;  %v1164_v15 = vld [vmem:[%s3638_s6 + $0x10] sm:$0xff]  ;;  %1512 = vmatpush.msra.mxu0 %v1453_v56  ;;  %1642 = vmatpush.msra.mxu2 %v1485_v13  ;;  %v1467_v18 = vld [vmem:[%s3639_s10 + $0xc0] sm:$0xff] }
 0x5f1   :  { %v1211_v59 = vmul.f32 %v1189_v62, %v1163_v35  ;;  %1577 = vmatpush.msra.mxu1 %v1469_v37  ;;  %v1483_v35 = vld [vmem:[%s3639_s10 + $0x140] sm:$0xff]  ;;  %v1466_v62 = vld [vmem:[%s3639_s10 + $0xb8] sm:$0xff] }
 0x5f2   :  { %v1193_v16 = vmul.f32 0.5, %v1192_v58  ;;  %1513 = vmatpush.msra.mxu0 %v1452_v0  ;;  %v1499_v49 = vld [vmem:[%s3639_s10 + $0x1c0] sm:$0xff]  ;;  %v1450_v58 = vld [vmem:[%s3639_s10 + $0x38] sm:$0xff] }
 0x5f3   :  { %1234 = vperm.xlu2 %1839, %v1211_v59   ;;  %v1220_v41 = vmul.f32 %v1211_v59, %v2958_v38  ;;  %v1832_v38 = vld [vmem:[%s3638_s6 + $0x30] sm:$0xff]  ;;  %1578 = vmatpush.msra.mxu1 %v1468_v55  ;;  %v1482_v59 = vld [vmem:[%s3639_s10 + $0x138] sm:$0xff] }
 0x5f4   :  { %v1194_v2 = vsub.f32 1.5, %v1193_v16  ;;  %1514 = vmatpush.msra.mxu0 %v1451_v30  ;;  %v1498_v16 = vld [vmem:[%s3639_s10 + $0x1b8] sm:$0xff] }
 0x5f5   :  { %v2040_v42 = vpop.eup %2039  ;;  %v1224_v1 = vsub.f32 %v1831_v53, %v1220_v41  ;;  %1579 = vmatpush.msra.mxu1 %v1467_v18  ;;  %v1449_v53 = vld [vmem:[%s3639_s10 + $0x30] sm:$0xff] }
 0x5f6   :  { %v1201_v57 = vmul.f32 %v2040_v42, %v1169_v12  ;;  %v1195_v5 = vmul.f32 %v2038_v10, %v1194_v2  ;;  %vm1207_vm15 = vweird.f32 %v2040_v42  ;;  %v1500_v12 = vld [vmem:[%s3639_s10 + $0x1c8] sm:$0xff]  ;;  %v1465_v41 = vld [vmem:[%s3639_s10 + $0xb0] sm:$0xff]  ;;  %1515 = vmatpush.msra.mxu0 %v1450_v58 }
 0x5f7   :  { %1270 = vperm.xlu0 %1840, %v1224_v1   ;;  %vm1208_vm4 = vmor %vm1206_vm3, %vm1207_vm15  ;;  %1580 = vmatpush.msra.mxu1 %v1466_v62  ;;  %v1481_v2 = vld [vmem:[%s3639_s10 + $0x130] sm:$0xff]  ;;  %v1448_v1 = vld [vmem:[%s3639_s10 + $0x28] sm:$0xff] }
 0x5f8   :  { %v1202_v44 = vmul.f32 %v2040_v42, %v1201_v57  ;;  %v1199_v21 = vsel %vm1198_vm14, %v2038_v10, %v1195_v5  ;;  %v1484_v10 = vld [vmem:[%s3639_s10 + $0x148] sm:$0xff]  ;;  %1516 = vmatpush.msra.mxu0 %v1449_v53  ;;  %v1349_v62 = vld [vmem:[%s3641_s8 + $0x110] sm:$0xff] }
 0x5f9   :  { %v1212_v23 = vmul.f32 %v1199_v21, %v1164_v15  ;;  %1643 = vmatpush.msra.mxu2 %v1484_v10  ;;  %v1464_v57 = vld [vmem:[%s3639_s10 + $0xa8] sm:$0xff]  ;;  %1581 = vmatpush.msra.mxu1 %v1465_v41  ;;  %v1463_v21 = vld [vmem:[%s3639_s10 + $0xa0] sm:$0xff] }
 0x5fa   :  { %v1203_v22 = vmul.f32 0.5, %v1202_v44  ;;  %v1480_v15 = vld [vmem:[%s3639_s10 + $0x128] sm:$0xff]  ;;  %1517 = vmatpush.msra.mxu0 %v1448_v1  ;;  %v1447_v44 = vld [vmem:[%s3639_s10 + $0x20] sm:$0xff] }
 0x5fb   :  { %1239 = vperm.xlu1 %1838, %v1212_v23   ;;  %v1221_v14 = vmul.f32 %v1212_v23, %v2965_v50  ;;  %1644 = vmatpush.msra.mxu2 %v1483_v35  ;;  %v1496_v5 = vld [vmem:[%s3639_s10 + $0x1a8] sm:$0xff]  ;;  %v1479_v23 = vld [vmem:[%s3639_s10 + $0x120] sm:$0xff] }
 0x5fc   :  { %v1204_v33 = vsub.f32 1.5, %v1203_v22  ;;  %1582 = vmatpush.msra.mxu1 %v1464_v57  ;;  %1518 = vmatpush.msra.mxu0 %v1447_v44  ;;  %v1495_v22 = vld [vmem:[%s3639_s10 + $0x1a0] sm:$0xff]  ;;  %v1348_v58 = vld [vmem:[%s3641_s8 + $0x108] sm:$0xff] }
 0x5fd   :  { %v1225_v26 = vsub.f32 %v1832_v38, %v1221_v14  ;;  %1645 = vmatpush.msra.mxu2 %v1482_v59  ;;  %v1446_v38 = vld [vmem:[%s3639_s10 + $0x18] sm:$0xff]  ;;  %v1315_v10 = vld [vmem:[%s3641_s8] sm:$0xff]  ;;  %v1364_v1 = vld [vmem:[%s3641_s8 + $0x188] sm:$0xff] }
 0x5fe   :  { %v1205_v34 = vmul.f32 %v2040_v42, %v1204_v33  ;;  %1583 = vmatpush.msra.mxu1 %v1463_v21  ;;  %v1462_v14 = vld [vmem:[%s3639_s10 + $0x98] sm:$0xff]  ;;  %1519 = vmatpush.msra.mxu0 %v1446_v38 }
 0x5ff   :  { %1275 = vperm.xlu0 %1840, %v1225_v26   ;;  %1646 = vmatpush.msra.mxu2 %v1481_v2  ;;  %v1478_v33 = vld [vmem:[%s3639_s10 + $0x118] sm:$0xff] }
 0x600   :  { %v1209_v7 = vsel %vm1208_vm4, %v2040_v42, %v1205_v34  ;;  %v1497_v42 = vld [vmem:[%s3639_s10 + $0x1b0] sm:$0xff]  ;;  %v1494_v26 = vld [vmem:[%s3639_s10 + $0x198] sm:$0xff]  ;;  %1584 = vmatpush.msra.mxu1 %v1462_v14 }
 0x601   :  { %v1213_v3 = vmul.f32 %v1209_v7, %v1165_v20  ;;  %1647 = vmatpush.msra.mxu2 %v1480_v15  ;;  %v1445_v20 = vld [vmem:[%s3639_s10 + $0x10] sm:$0xff]  ;;  %v1350_v2 = vld [vmem:[%s3641_s8 + $0x118] sm:$0xff] }
 0x602   :  { %v1461_v34 = vld [vmem:[%s3639_s10 + $0x90] sm:$0xff]  ;;  %1520 = vmatpush.msra.mxu0 %v1445_v20 }
 0x603   :  { %1244 = vperm.xlu2 %1839, %v1213_v3   ;;  %v1222_v50 = vmul.f32 %v1213_v3, %v2976_v46  ;;  %v1503_v46 = vld [vmem:[%s3639_s10 + $0x1e0] sm:$0xff]  ;;  %1648 = vmatpush.msra.mxu2 %v1479_v23  ;;  %v1477_v7 = vld [vmem:[%s3639_s10 + $0x110] sm:$0xff] }
 0x604   :  { %1705 = vmatpush.msra.mxu3 %v1503_v46  ;;  %1585 = vmatpush.msra.mxu1 %v1461_v34  ;;  %v1493_v3 = vld [vmem:[%s3639_s10 + $0x190] sm:$0xff]  ;;  %v1491_v46 = vld [vmem:[%s3639_s10 + $0x180] sm:$0xff] }
 0x605   :  { %v1226_v63 = vsub.f32 %v1833_v43, %v1222_v50  ;;  %1649 = vmatpush.msra.mxu2 %v1478_v33  ;;  %v1444_v43 = vld [vmem:[%s3639_s10 + $0x8] sm:$0xff] }
 0x606   :  { %1706 = vmatpush.msra.mxu3 %v1502_v40  ;;  %v1460_v50 = vld [vmem:[%s3639_s10 + $0x88] sm:$0xff]  ;;  %1521 = vmatpush.msra.mxu0 %v1444_v43 }
 0x607   :  { %1771 = vperm.xlu0 %1840, %v1768_v60   ;;  %1280 = vperm.xlu1 %1838, %v1226_v63   ;;  %v1476_v60 = vld [vmem:[%s3639_s10 + $0x108] sm:$0xff] }
 0x608   :  { %1707 = vmatpush.msra.mxu3 %v1501_v48  ;;  %1650 = vmatpush.msra.mxu2 %v1477_v7  ;;  %v1492_v63 = vld [vmem:[%s3639_s10 + $0x188] sm:$0xff]  ;;  %v1319_v7 = vld [vmem:[%s3641_s8 + $0x20] sm:$0xff] }
 0x609   :  { %1586 = vmatpush.msra.mxu1 %v1460_v50  ;;  %1522 = vmatpush.msra.mxu0 %v1443_v31 }
 0x60a   :  { %1708 = vmatpush.msra.mxu3 %v1500_v12  ;;  %1651 = vmatpush.msra.mxu2 %v1476_v60  ;;  %v1316_v12 = vld [vmem:[%s3641_s8 + $0x8] sm:$0xff] }
 0x60b   :  { %1587 = vmatpush.msra.mxu1 %v1459_v28 }
 0x60c   :  { %1709 = vmatpush.msra.mxu3 %v1499_v49  ;;  %1652 = vmatpush.msra.mxu2 %v1475_v36  ;;  %v1347_v49 = vld [vmem:[%s3641_s8 + $0x100] sm:$0xff]  ;;  %v1321_v36 = vld [vmem:[%s3641_s8 + $0x30] sm:$0xff] }
 0x60e   :  { %1710 = vmatpush.msra.mxu3 %v1498_v16 }
 0x610   :  { %1711 = vmatpush.msra.mxu3 %v1497_v42  ;;  %v1363_v42 = vld [vmem:[%s3641_s8 + $0x180] sm:$0xff] }
 0x612   :  { %1712 = vmatpush.msra.mxu3 %v1496_v5 }
 0x614   :  { %1713 = vmatpush.msra.mxu3 %v1495_v22 }
 0x616   :  { %1714 = vmatpush.msra.mxu3 %v1494_v26 }
 0x618   :  { %1715 = vmatpush.msra.mxu3 %v1493_v3  ;;  %v1320_v3 = vld [vmem:[%s3641_s8 + $0x28] sm:$0xff] }
 0x61a   :  { %1716 = vmatpush.msra.mxu3 %v1492_v63 }
 0x61c   :  { %1717 = vmatpush.msra.mxu3 %v1491_v46  ;;  %v1322_v46 = vld [vmem:[%s3641_s8 + $0x38] sm:$0xff] }
 0x65d   :  { %v1230_v32 = vpop.permute.xlu0 %1229 }
 0x65e   :  { %v1247_v4 = vmul.f32 %v1230_v32, %v2874_v11  ;;  %v1248_v47 = vmul.f32 %v1230_v32, %v2881_v45  ;;  %v1249_v40 = vmul.f32 %v1230_v32, %v2888_v8  ;;  %v1250_v56 = vmul.f32 %v1230_v32, %v2885_v19  ;;  %v1317_v11 = vld [vmem:[%s3641_s8 + $0x10] sm:$0xff]  ;;  %v1318_v45 = vld [vmem:[%s3641_s8 + $0x18] sm:$0xff]  ;;  %v1235_v19 = vpop.permute.xlu2 %1234 }
 0x65f   :  { %v1251_v57 = vmul.f32 %v1235_v19, %v2896_v27  ;;  %v1252_v15 = vmul.f32 %v1235_v19, %v2900_v52  ;;  %v1253_v5 = vmul.f32 %v1235_v19, %v2907_v51  ;;  %v1254_v44 = vmul.f32 %v1235_v19, %v2904_v17  ;;  %v1365_v27 = vld [vmem:[%s3641_s8 + $0x190] sm:$0xff]  ;;  %v1366_v52 = vld [vmem:[%s3641_s8 + $0x198] sm:$0xff]  ;;  %v1368_v19 = vld [vmem:[%s3641_s8 + $0x1a8] sm:$0xff] }
 0x661   :  { %v1266_v37 = vpop.permute.xlu1 %1265 }
 0x662   :  { %v1283_v13 = vadd.f32 %v1266_v37, %v1247_v4  ;;  %v1284_v48 = vadd.f32 %v1266_v37, %v1248_v47  ;;  %v1285_v0 = vadd.f32 %v1266_v37, %v1249_v40  ;;  %v1286_v55 = vadd.f32 %v1266_v37, %v1250_v56  ;;  %v1351_v4 = vld [vmem:[%s3641_s8 + $0x120] sm:$0xff]  ;;  %v1352_v47 = vld [vmem:[%s3641_s8 + $0x128] sm:$0xff]  ;;  %v1353_v40 = vld [vmem:[%s3641_s8 + $0x130] sm:$0xff] }
 0x664   :  { %v3220_v8 = vmax.f32 %v1283_v13, 0.0  ;;  %v3222_v30 = vmax.f32 %v1284_v48, 0.0  ;;  %v3224_v18 = vmax.f32 %v1285_v0, 0.0  ;;  %v3226_v35 = vmax.f32 %v1286_v55, 0.0 }
 0x666   :  { %v1379_v59 = vmul.f32 %v1315_v10, %v3220_v8  ;;  %v1380_v16 = vmul.f32 %v1316_v12, %v3222_v30  ;;  %v1381_v53 = vmul.f32 %v1317_v11, %v3224_v18  ;;  %v1382_v41 = vmul.f32 %v1318_v45, %v3226_v35  ;;  %v1354_v11 = vld [vmem:[%s3641_s8 + $0x138] sm:$0xff]  ;;  %v1367_v45 = vld [vmem:[%s3641_s8 + $0x1a0] sm:$0xff] }
 0x667   :  { %v3255_v21 = vmul.f32 %v1347_v49, %v3220_v8  ;;  %v3258_v23 = vmul.f32 %v1348_v58, %v3222_v30  ;;  %v3261_v22 = vmul.f32 %v1349_v62, %v3224_v18  ;;  %v3270_v51 = vmul.f32 %v1350_v2, %v3226_v35  ;;  %v1369_v49 = vld [vmem:[%s3641_s8 + $0x1b0] sm:$0xff]  ;;  %v1323_v2 = vld [vmem:[%s3641_s8 + $0x40] sm:$0xff] }
 0x668   :  { %1523 = vmatmul.f32.vlgmr.msra.gmra.mxu0 %v1379_v59  ;;  %1588 = vmatmul.f32.vlgmr.msra.gmra.mxu1 %v1380_v16  ;;  %v3273_v38 = vmul.f32 %v1363_v42, %v3220_v8  ;;  %v3276_v14 = vmul.f32 %v1364_v1, %v3222_v30  ;;  %v3285_v43 = vmul.f32 %v1365_v27, %v3224_v18  ;;  %v1370_v16 = vld [vmem:[%s3641_s8 + $0x1b8] sm:$0xff]  ;;  %v1324_v42 = vld [vmem:[%s3641_s8 + $0x48] sm:$0xff]  ;;  %v1325_v1 = vld [vmem:[%s3641_s8 + $0x50] sm:$0xff] }
 0x669   :  { %1653 = vmatmul.f32.vlgmr.msra.gmra.mxu2 %v1381_v53  ;;  %1718 = vmatmul.f32.vlgmr.msra.gmra.mxu3 %v1382_v41  ;;  %v1271_v17 = vpop.permute.xlu0 %1270  ;;  %v3288_v50 = vmul.f32 %v1366_v52, %v3226_v35  ;;  %v1245_v53 = vpop.permute.xlu2 %1244 }
 0x66a   :  { %v1287_v33 = vadd.f32 %v1271_v17, %v1251_v57  ;;  %v1288_v26 = vadd.f32 %v1271_v17, %v1252_v15  ;;  %v1289_v20 = vadd.f32 %v1271_v17, %v1253_v5  ;;  %v1290_v34 = vadd.f32 %v1271_v17, %v1254_v44  ;;  %v1326_v17 = vld [vmem:[%s3641_s8 + $0x58] sm:$0xff] }
 0x66c   :  { %v3290_v60 = vmax.f32 %v1287_v33, 0.0  ;;  %v3292_v63 = vmax.f32 %v1288_v26, 0.0  ;;  %v3294_v31 = vmax.f32 %v1289_v20, 0.0  ;;  %v3296_v28 = vmax.f32 %v1290_v34, 0.0  ;;  %v1355_v33 = vld [vmem:[%s3641_s8 + $0x140] sm:$0xff]  ;;  %v1356_v34 = vld [vmem:[%s3641_s8 + $0x148] sm:$0xff] }
 0x66d   :  { %v1240_v32 = vpop.permute.xlu1 %1239 }
 0x66e   :  { %v1383_v56 = vmul.f32 %v1319_v7, %v3290_v60  ;;  %v1384_v37 = vmul.f32 %v1320_v3, %v3292_v63  ;;  %v1385_v13 = vmul.f32 %v1321_v36, %v3294_v31  ;;  %v1386_v48 = vmul.f32 %v1322_v46, %v3296_v28  ;;  %v1357_v7 = vld [vmem:[%s3641_s8 + $0x150] sm:$0xff]  ;;  %v1358_v3 = vld [vmem:[%s3641_s8 + $0x158] sm:$0xff] }
 0x66f   :  { %v1255_v0 = vmul.f32 %v1240_v32, %v2915_v6  ;;  %v1256_v55 = vmul.f32 %v1240_v32, %v2919_v24  ;;  %v1257_v10 = vmul.f32 %v1240_v32, %v2926_v61  ;;  %v1258_v12 = vmul.f32 %v1240_v32, %v2923_v54 }
 0x670   :  { %1526 = vmatmul.f32.gmra.mxu0 %v1383_v56  ;;  %1591 = vmatmul.f32.gmra.mxu1 %v1384_v37  ;;  %v3331_v24 = vmul.f32 %v1351_v4, %v3290_v60  ;;  %v3334_v54 = vmul.f32 %v1352_v47, %v3292_v63  ;;  %v3337_v61 = vmul.f32 %v1353_v40, %v3294_v31  ;;  %v1371_v40 = vld [vmem:[%s3641_s8 + $0x1c0] sm:$0xff]  ;;  %v1372_v56 = vld [vmem:[%s3641_s8 + $0x1c8] sm:$0xff]  ;;  %v1373_v37 = vld [vmem:[%s3641_s8 + $0x1d0] sm:$0xff] }
 0x671   :  { %v1276_v6 = vpop.permute.xlu0 %1275  ;;  %1656 = vmatmul.f32.gmra.mxu2 %v1385_v13  ;;  %1721 = vmatmul.f32.gmra.mxu3 %v1386_v48  ;;  %v3355_v57 = vmul.f32 %v1354_v11, %v3296_v28  ;;  %v3358_v15 = vmul.f32 %v1367_v45, %v3290_v60  ;;  %v3361_v5 = vmul.f32 %v1368_v19, %v3292_v63 }
 0x672   :  { %v1291_v58 = vadd.f32 %v1276_v6, %v1255_v0  ;;  %v1292_v62 = vadd.f32 %v1276_v6, %v1256_v55  ;;  %v1293_v59 = vadd.f32 %v1276_v6, %v1257_v10  ;;  %v1294_v41 = vadd.f32 %v1276_v6, %v1258_v12 }
 0x673   :  { %v3376_v26 = vmul.f32 %v1369_v49, %v3294_v31  ;;  %v3390_v36 = vmul.f32 %v1370_v16, %v3296_v28  ;;  %v1259_v46 = vmul.f32 %v1245_v53, %v2934_v29  ;;  %v1260_v29 = vmul.f32 %v1245_v53, %v2938_v9  ;;  %v1374_v9 = vld [vmem:[%s3641_s8 + $0x1d8] sm:$0xff]  ;;  %v1328_v16 = vld [vmem:[%s3641_s8 + $0x68] sm:$0xff] }
 0x674   :  { %v3363_v44 = vmax.f32 %v1291_v58, 0.0  ;;  %v3365_v27 = vmax.f32 %v1292_v62, 0.0  ;;  %v3367_v52 = vmax.f32 %v1293_v59, 0.0  ;;  %v3378_v20 = vmax.f32 %v1294_v41, 0.0  ;;  %v1327_v59 = vld [vmem:[%s3641_s8 + $0x60] sm:$0xff] }
 0x675   :  { %v1261_v13 = vmul.f32 %v1245_v53, %v2945_v39  ;;  %v1262_v48 = vmul.f32 %v1245_v53, %v2942_v25  ;;  %v1329_v53 = vld [vmem:[%s3641_s8 + $0x70] sm:$0xff] }
 0x676   :  { %v1387_v32 = vmul.f32 %v1323_v2, %v3363_v44  ;;  %v1388_v4 = vmul.f32 %v1324_v42, %v3365_v27  ;;  %v1389_v47 = vmul.f32 %v1325_v1, %v3367_v52  ;;  %v1390_v0 = vmul.f32 %v1326_v17, %v3378_v20  ;;  %v1330_v17 = vld [vmem:[%s3641_s8 + $0x78] sm:$0xff] }
 0x677   :  { %v3410_v55 = vmul.f32 %v1355_v33, %v3363_v44  ;;  %v3413_v10 = vmul.f32 %v1356_v34, %v3365_v27  ;;  %v3416_v12 = vmul.f32 %v1357_v7, %v3367_v52  ;;  %v3419_v11 = vmul.f32 %v1358_v3, %v3378_v20  ;;  %v1359_v33 = vld [vmem:[%s3641_s8 + $0x160] sm:$0xff]  ;;  %v1360_v7 = vld [vmem:[%s3641_s8 + $0x168] sm:$0xff]  ;;  %v1361_v3 = vld [vmem:[%s3641_s8 + $0x170] sm:$0xff] }
 0x678   :  { %1529 = vmatmul.f32.gmra.mxu0 %v1387_v32  ;;  %1594 = vmatmul.f32.gmra.mxu1 %v1388_v4  ;;  %v3425_v39 = vmul.f32 %v1371_v40, %v3363_v44  ;;  %v3428_v45 = vmul.f32 %v1372_v56, %v3365_v27  ;;  %v3431_v19 = vmul.f32 %v1373_v37, %v3367_v52  ;;  %v1375_v40 = vld [vmem:[%s3641_s8 + $0x1e0] sm:$0xff]  ;;  %v1376_v56 = vld [vmem:[%s3641_s8 + $0x1e8] sm:$0xff]  ;;  %v1377_v37 = vld [vmem:[%s3641_s8 + $0x1f0] sm:$0xff] }
 0x679   :  { %v1281_v25 = vpop.permute.xlu1 %1280  ;;  %1659 = vmatmul.f32.gmra.mxu2 %v1389_v47  ;;  %1724 = vmatmul.f32.gmra.mxu3 %v1390_v0  ;;  %v3443_v41 = vmul.f32 %v1374_v9, %v3378_v20 }
 0x67a   :  { %v1295_v6 = vadd.f32 %v1281_v25, %v1259_v46  ;;  %v1296_v49 = vadd.f32 %v1281_v25, %v1260_v29  ;;  %v1297_v58 = vadd.f32 %v1281_v25, %v1261_v13  ;;  %v1298_v62 = vadd.f32 %v1281_v25, %v1262_v48  ;;  %v1362_v46 = vld [vmem:[%s3641_s8 + $0x178] sm:$0xff] }
 0x67b   :  { %v1378_v13 = vld [vmem:[%s3641_s8 + $0x1f8] sm:$0xff] }
 0x67c   :  { %v3445_v2 = vmax.f32 %v1295_v6, 0.0  ;;  %v3447_v42 = vmax.f32 %v1296_v49, 0.0  ;;  %v3449_v1 = vmax.f32 %v1297_v58, 0.0  ;;  %v3457_v34 = vmax.f32 %v1298_v62, 0.0 }
 0x67e   :  { %v1391_v32 = vmul.f32 %v1327_v59, %v3445_v2  ;;  %v1392_v4 = vmul.f32 %v1328_v16, %v3447_v42  ;;  %v1393_v47 = vmul.f32 %v1329_v53, %v3449_v1  ;;  %v1394_v29 = vmul.f32 %v1330_v17, %v3457_v34  ;;  %v1331_v59 = vld [vmem:[%s3641_s8 + $0x80] sm:$0xff]  ;;  %v1332_v16 = vld [vmem:[%s3641_s8 + $0x88] sm:$0xff]  ;;  %v1333_v53 = vld [vmem:[%s3641_s8 + $0x90] sm:$0xff] }
 0x67f   :  { %v3485_v48 = vmul.f32 %v1359_v33, %v3445_v2  ;;  %v3488_v0 = vmul.f32 %v1360_v7, %v3447_v42  ;;  %v3491_v9 = vmul.f32 %v1361_v3, %v3449_v1  ;;  %v3494_v25 = vmul.f32 %v1362_v46, %v3457_v34  ;;  %v1334_v17 = vld [vmem:[%s3641_s8 + $0x98] sm:$0xff] }
 0x680   :  { %1532 = vmatmul.f32.gmra.mxu0 %v1391_v32  ;;  %1597 = vmatmul.f32.gmra.mxu1 %v1392_v4  ;;  %v3497_v6 = vmul.f32 %v1375_v40, %v3445_v2  ;;  %v3500_v49 = vmul.f32 %v1376_v56, %v3447_v42  ;;  %v3503_v58 = vmul.f32 %v1377_v37, %v3449_v1  ;;  %v1335_v32 = vld [vmem:[%s3641_s8 + $0xa0] sm:$0xff]  ;;  %v1336_v4 = vld [vmem:[%s3641_s8 + $0xa8] sm:$0xff] }
 0x681   :  { %1662 = vmatmul.f32.gmra.mxu2 %v1393_v47  ;;  %1727 = vmatmul.f32.gmra.mxu3 %v1394_v29  ;;  %v3506_v62 = vmul.f32 %v1378_v13, %v3457_v34  ;;  %v1395_v33 = vmul.f32 %v1331_v59, %v3220_v8  ;;  %v1396_v7 = vmul.f32 %v1332_v16, %v3222_v30  ;;  %v1337_v8 = vld [vmem:[%s3641_s8 + $0xb0] sm:$0xff]  ;;  %v1338_v30 = vld [vmem:[%s3641_s8 + $0xb8] sm:$0xff]  ;;  %v1339_v56 = vld [vmem:[%s3641_s8 + $0xc0] sm:$0xff] }
 0x682   :  { %v1397_v3 = vmul.f32 %v1333_v53, %v3224_v18  ;;  %v1398_v46 = vmul.f32 %v1334_v17, %v3226_v35  ;;  %v1399_v18 = vmul.f32 %v1335_v32, %v3290_v60  ;;  %v1400_v35 = vmul.f32 %v1336_v4, %v3292_v63  ;;  %v1340_v37 = vld [vmem:[%s3641_s8 + $0xc8] sm:$0xff]  ;;  %v1341_v60 = vld [vmem:[%s3641_s8 + $0xd0] sm:$0xff]  ;;  %v1342_v63 = vld [vmem:[%s3641_s8 + $0xd8] sm:$0xff] }
 0x683   :  { %v1401_v47 = vmul.f32 %v1337_v8, %v3294_v31  ;;  %v1402_v40 = vmul.f32 %v1338_v30, %v3296_v28  ;;  %v1403_v31 = vmul.f32 %v1339_v56, %v3363_v44  ;;  %v1404_v28 = vmul.f32 %v1340_v37, %v3365_v27  ;;  %v1343_v59 = vld [vmem:[%s3641_s8 + $0xe0] sm:$0xff]  ;;  %v1344_v16 = vld [vmem:[%s3641_s8 + $0xe8] sm:$0xff]  ;;  %v1345_v44 = vld [vmem:[%s3641_s8 + $0xf0] sm:$0xff] }
 0x684   :  { %v1405_v29 = vmul.f32 %v1341_v60, %v3367_v52  ;;  %v1406_v13 = vmul.f32 %v1342_v63, %v3378_v20  ;;  %v1346_v27 = vld [vmem:[%s3641_s8 + $0xf8] sm:$0xff]  ;;  %v1407_v52 = vmul.f32 %v1343_v59, %v3445_v2  ;;  %v1408_v20 = vmul.f32 %v1344_v16, %v3447_v42 }
 0x685   :  { %v1409_v53 = vmul.f32 %v1345_v44, %v3449_v1  ;;  %v1410_v17 = vmul.f32 %v1346_v27, %v3457_v34 }
 0x688   :  { %1535 = vmatmul.f32.gmra.mxu0 %v1395_v33  ;;  %1600 = vmatmul.f32.gmra.mxu1 %v1396_v7 }
 0x689   :  { %1665 = vmatmul.f32.gmra.mxu2 %v1397_v3  ;;  %1730 = vmatmul.f32.gmra.mxu3 %v1398_v46 }
 0x690   :  { %1538 = vmatmul.f32.gmra.mxu0 %v1399_v18  ;;  %1603 = vmatmul.f32.gmra.mxu1 %v1400_v35 }
 0x691   :  { %1668 = vmatmul.f32.gmra.mxu2 %v1401_v47  ;;  %1733 = vmatmul.f32.gmra.mxu3 %v1402_v40 }
 0x698   :  { %1541 = vmatmul.f32.gmra.mxu0 %v1403_v31  ;;  %1606 = vmatmul.f32.gmra.mxu1 %v1404_v28 }
 0x699   :  { %1671 = vmatmul.f32.gmra.mxu2 %v1405_v29  ;;  %1736 = vmatmul.f32.gmra.mxu3 %v1406_v13 }
 0x6a0   :  { %1544 = vmatmul.f32.gmra.mxu0 %v1407_v52  ;;  %1609 = vmatmul.f32.gmra.mxu1 %v1408_v20 }
 0x6a1   :  { %1674 = vmatmul.f32.gmra.mxu2 %v1409_v53  ;;  %1739 = vmatmul.f32.gmra.mxu3 %v1410_v17 }
 0x6a8   :  { %1547 = vmatmul.f32.gmra.mxu0 %v3255_v21  ;;  %1612 = vmatmul.f32.gmra.mxu1 %v3258_v23 }
 0x6a9   :  { %1677 = vmatmul.f32.gmra.mxu2 %v3261_v22  ;;  %1742 = vmatmul.f32.gmra.mxu3 %v3270_v51 }
 0x6b0   :  { %1550 = vmatmul.f32.gmra.mxu0 %v3331_v24  ;;  %1615 = vmatmul.f32.gmra.mxu1 %v3334_v54 }
 0x6b1   :  { %1680 = vmatmul.f32.gmra.mxu2 %v3337_v61  ;;  %1745 = vmatmul.f32.gmra.mxu3 %v3355_v57 }
 0x6b8   :  { %1553 = vmatmul.f32.gmra.mxu0 %v3410_v55  ;;  %1618 = vmatmul.f32.gmra.mxu1 %v3413_v10 }
 0x6b9   :  { %1683 = vmatmul.f32.gmra.mxu2 %v3416_v12  ;;  %1748 = vmatmul.f32.gmra.mxu3 %v3419_v11 }
 0x6c0   :  { %1556 = vmatmul.f32.gmra.mxu0 %v3485_v48  ;;  %1621 = vmatmul.f32.gmra.mxu1 %v3488_v0 }
 0x6c1   :  { %1686 = vmatmul.f32.gmra.mxu2 %v3491_v9  ;;  %1751 = vmatmul.f32.gmra.mxu3 %v3494_v25 }
 0x6c8   :  { %1559 = vmatmul.f32.gmra.mxu0 %v3273_v38  ;;  %1624 = vmatmul.f32.gmra.mxu1 %v3276_v14 }
 0x6c9   :  { %1689 = vmatmul.f32.gmra.mxu2 %v3285_v43  ;;  %1754 = vmatmul.f32.gmra.mxu3 %v3288_v50 }
 0x6d0   :  { %1562 = vmatmul.f32.gmra.mxu0 %v3358_v15  ;;  %1627 = vmatmul.f32.gmra.mxu1 %v3361_v5 }
 0x6d1   :  { %1692 = vmatmul.f32.gmra.mxu2 %v3376_v26  ;;  %1757 = vmatmul.f32.gmra.mxu3 %v3390_v36 }
 0x6d8   :  { %1565 = vmatmul.f32.gmra.mxu0 %v3425_v39  ;;  %1630 = vmatmul.f32.gmra.mxu1 %v3428_v45 }
 0x6d9   :  { %1695 = vmatmul.f32.gmra.mxu2 %v3431_v19  ;;  %1760 = vmatmul.f32.gmra.mxu3 %v3443_v41 }
 0x6e0   :  { %1568 = vmatmul.f32.gmra.mxu0 %v3497_v6  ;;  %1633 = vmatmul.f32.gmra.mxu1 %v3500_v49 }
 0x6e1   :  { %1698 = vmatmul.f32.gmra.mxu2 %v3503_v58  ;;  %1763 = vmatmul.f32.gmra.mxu3 %v3506_v62 }
 0x6e5   :  { %v1524_v21 = vpop.f32.mrf.mxu0  ;;  %v1589_v23 = vpop.f32.mrf.mxu1 }
 0x6e6   :  { %v1590_v22 = vadd.f32 %v1589_v23, %v1524_v21 }
 0x6ec   :  { %v1654_v51 = vpop.f32.mrf.mxu2  ;;  %v1719_v38 = vpop.f32.mrf.mxu3 }
 0x6ed   :  { %v1655_v14 = vadd.f32 %v1654_v51, %v1590_v22  ;;  %v1527_v43 = vpop.f32.mrf.mxu0  ;;  %v1592_v50 = vpop.f32.mrf.mxu1 }
 0x6ee   :  { %v1593_v54 = vadd.f32 %v1592_v50, %v1527_v43 }
 0x6ef   :  { %v3604_v24 = vadd.f32 %v1719_v38, %v1655_v14 }
 0x6f4   :  { %v1657_v61 = vpop.f32.mrf.mxu2  ;;  %v1722_v57 = vpop.f32.mrf.mxu3 }
 0x6f5   :  { %v1658_v15 = vadd.f32 %v1657_v61, %v1593_v54  ;;  %v1530_v5 = vpop.f32.mrf.mxu0  ;;  %v1595_v26 = vpop.f32.mrf.mxu1 }
 0x6f6   :  { %v1596_v36 = vadd.f32 %v1595_v26, %v1530_v5 }
 0x6f7   :  { %v3606_v55 = vadd.f32 %v1722_v57, %v1658_v15 }
 0x6fc   :  { %v1660_v10 = vpop.f32.mrf.mxu2  ;;  %v1725_v12 = vpop.f32.mrf.mxu3 }
 0x6fd   :  { %v1661_v11 = vadd.f32 %v1660_v10, %v1596_v36  ;;  %v1533_v39 = vpop.f32.mrf.mxu0  ;;  %v1598_v45 = vpop.f32.mrf.mxu1 }
 0x6fe   :  { %v1599_v19 = vadd.f32 %v1598_v45, %v1533_v39 }
 0x6ff   :  { %v3608_v41 = vadd.f32 %v1725_v12, %v1661_v11 }
 0x704   :  { %v1663_v2 = vpop.f32.mrf.mxu2  ;;  %v1728_v42 = vpop.f32.mrf.mxu3 }
 0x705   :  { %v1664_v1 = vadd.f32 %v1663_v2, %v1599_v19  ;;  %v1536_v34 = vpop.f32.mrf.mxu0  ;;  %v1601_v48 = vpop.f32.mrf.mxu1 }
 0x706   :  { %v1602_v0 = vadd.f32 %v1601_v48, %v1536_v34 }
 0x707   :  { %v3610_v9 = vadd.f32 %v1728_v42, %v1664_v1 }
 0x70c   :  { %v1666_v25 = vpop.f32.mrf.mxu2  ;;  %v1731_v6 = vpop.f32.mrf.mxu3 }
 0x70d   :  { %v1667_v49 = vadd.f32 %v1666_v25, %v1602_v0  ;;  %v1539_v58 = vpop.f32.mrf.mxu0  ;;  %v1604_v62 = vpop.f32.mrf.mxu1 }
 0x70e   :  { %v1605_v33 = vadd.f32 %v1604_v62, %v1539_v58 }
 0x70f   :  { %v3612_v7 = vadd.f32 %v1731_v6, %v1667_v49 }
 0x714   :  { %v1669_v3 = vpop.f32.mrf.mxu2  ;;  %v1734_v46 = vpop.f32.mrf.mxu3 }
 0x715   :  { %v1670_v32 = vadd.f32 %v1669_v3, %v1605_v33  ;;  %v1542_v4 = vpop.f32.mrf.mxu0  ;;  %v1607_v8 = vpop.f32.mrf.mxu1 }
 0x716   :  { %v1608_v30 = vadd.f32 %v1607_v8, %v1542_v4 }
 0x717   :  { %v3614_v18 = vadd.f32 %v1734_v46, %v1670_v32 }
 0x71c   :  { %v1672_v35 = vpop.f32.mrf.mxu2  ;;  %v1737_v47 = vpop.f32.mrf.mxu3 }
 0x71d   :  { %v1673_v40 = vadd.f32 %v1672_v35, %v1608_v30  ;;  %v1545_v56 = vpop.f32.mrf.mxu0  ;;  %v1610_v37 = vpop.f32.mrf.mxu1 }
 0x71e   :  { %v1611_v60 = vadd.f32 %v1610_v37, %v1545_v56 }
 0x71f   :  { %v3616_v63 = vadd.f32 %v1737_v47, %v1673_v40 }
 0x724   :  { %v1675_v31 = vpop.f32.mrf.mxu2  ;;  %v1740_v28 = vpop.f32.mrf.mxu3 }
 0x725   :  { %v1676_v29 = vadd.f32 %v1675_v31, %v1611_v60  ;;  %v1548_v13 = vpop.f32.mrf.mxu0  ;;  %v1613_v59 = vpop.f32.mrf.mxu1 }
 0x726   :  { %v1614_v16 = vadd.f32 %v1613_v59, %v1548_v13  ;;  %v1767_v13 = vld [vmem:[%s3642_s11] sm:$0xf]  ;;  %v1772_v59 = vpop.permute.xlu0 %1771 }
 0x727   :  { %v1741_v44 = vadd.f32 %v1740_v28, %v1676_v29 }
 0x72c   :  { %v1678_v27 = vpop.f32.mrf.mxu2  ;;  %v1743_v52 = vpop.f32.mrf.mxu3 }
 0x72d   :  { %v1679_v20 = vadd.f32 %v1678_v27, %v1614_v16  ;;  %v1551_v53 = vpop.f32.mrf.mxu0  ;;  %v1616_v17 = vpop.f32.mrf.mxu1 }
 0x72e   :  { %v1617_v40 = vadd.f32 %v1616_v17, %v1551_v53 }
 0x72f   :  { %v1744_v21 = vadd.f32 %v1743_v52, %v1679_v20 }
 0x734   :  { %v1681_v23 = vpop.f32.mrf.mxu2  ;;  %v1746_v22 = vpop.f32.mrf.mxu3 }
 0x735   :  { %v1554_v51 = vpop.f32.mrf.mxu0  ;;  %v1619_v38 = vpop.f32.mrf.mxu1  ;;  %v1682_v60 = vadd.f32 %v1681_v23, %v1617_v40 }
 0x736   :  { %v1620_v30 = vadd.f32 %v1619_v38, %v1554_v51 }
 0x737   :  { %v1747_v29 = vadd.f32 %v1746_v22, %v1682_v60 }
 0x73c   :  { %v1684_v14 = vpop.f32.mrf.mxu2  ;;  %v1749_v43 = vpop.f32.mrf.mxu3 }
 0x73d   :  { %v1557_v50 = vpop.f32.mrf.mxu0  ;;  %v1622_v54 = vpop.f32.mrf.mxu1  ;;  %v1685_v56 = vadd.f32 %v1684_v14, %v1620_v30 }
 0x73e   :  { %v1623_v32 = vadd.f32 %v1622_v54, %v1557_v50 }
 0x73f   :  { %v1750_v28 = vadd.f32 %v1749_v43, %v1685_v56 }
 0x744   :  { %v1687_v61 = vpop.f32.mrf.mxu2  ;;  %v1752_v57 = vpop.f32.mrf.mxu3 }
 0x745   :  { %v1560_v15 = vpop.f32.mrf.mxu0  ;;  %v1625_v5 = vpop.f32.mrf.mxu1  ;;  %v1688_v35 = vadd.f32 %v1687_v61, %v1623_v32 }
 0x746   :  { %v1626_v33 = vadd.f32 %v1625_v5, %v1560_v15 }
 0x747   :  { %v1753_v31 = vadd.f32 %v1752_v57, %v1688_v35 }
 0x74c   :  { %v1690_v26 = vpop.f32.mrf.mxu2  ;;  %v1755_v36 = vpop.f32.mrf.mxu3 }
 0x74d   :  { %v1563_v10 = vpop.f32.mrf.mxu0  ;;  %v1628_v12 = vpop.f32.mrf.mxu1  ;;  %v1691_v4 = vadd.f32 %v1690_v26, %v1626_v33 }
 0x74e   :  { %v1629_v6 = vadd.f32 %v1628_v12, %v1563_v10 }
 0x74f   :  { %v1756_v37 = vadd.f32 %v1755_v36, %v1691_v4 }
 0x754   :  { %v1693_v11 = vpop.f32.mrf.mxu2  ;;  %v1758_v39 = vpop.f32.mrf.mxu3 }
 0x755   :  { %v1566_v45 = vpop.f32.mrf.mxu0  ;;  %v1631_v19 = vpop.f32.mrf.mxu1  ;;  %v1694_v3 = vadd.f32 %v1693_v11, %v1629_v6 }
 0x756   :  { %v1632_v48 = vadd.f32 %v1631_v19, %v1566_v45 }
 0x757   :  { %v1759_v47 = vadd.f32 %v1758_v39, %v1694_v3 }
 0x75c   :  { %v1696_v2 = vpop.f32.mrf.mxu2  ;;  %v1761_v42 = vpop.f32.mrf.mxu3 }
 0x75d   :  { %v1569_v1 = vpop.f32.mrf.mxu0  ;;  %v1634_v34 = vpop.f32.mrf.mxu1  ;;  %v1697_v49 = vadd.f32 %v1696_v2, %v1632_v48 }
 0x75e   :  { %v1635_v0 = vadd.f32 %v1634_v34, %v1569_v1 }
 0x75f   :  { %v1762_v8 = vadd.f32 %v1761_v42, %v1697_v49 }
 0x764   :  { %v1699_v25 = vpop.f32.mrf.mxu2  ;;  %v1764_v62 = vpop.f32.mrf.mxu3 }
 0x765   :  { %v1700_v58 = vadd.f32 %v1699_v25, %v1635_v0 }
 0x767   :  { %v1765_v46 = vadd.f32 %v1764_v62, %v1700_v58 }
 0x769   :  { %1774 = vmatpush.msrb.mxu0 %v1765_v46 }
 0x76b   :  { %1775 = vmatpush.msrb.mxu0 %v1762_v8 }
 0x76d   :  { %1776 = vmatpush.msrb.mxu0 %v1759_v47 }
 0x76f   :  { %1777 = vmatpush.msrb.mxu0 %v1756_v37 }
 0x771   :  { %1778 = vmatpush.msrb.mxu0 %v1753_v31 }
 0x773   :  { %1779 = vmatpush.msrb.mxu0 %v1750_v28 }
 0x775   :  { %1780 = vmatpush.msrb.mxu0 %v1747_v29 }
 0x777   :  { %1781 = vmatpush.msrb.mxu0 %v1744_v21 }
 0x779   :  { %1782 = vmatpush.msrb.mxu0 %v1741_v44 }
 0x77b   :  { %1783 = vmatpush.msrb.mxu0 %v3616_v63 }
 0x77d   :  { %1784 = vmatpush.msrb.mxu0 %v3614_v18 }
 0x77f   :  { %1785 = vmatpush.msrb.mxu0 %v3612_v7 }
 0x781   :  { %1786 = vmatpush.msrb.mxu0 %v3610_v9 }
 0x783   :  { %1787 = vmatpush.msrb.mxu0 %v3608_v41 }
 0x785   :  { %1788 = vmatpush.msrb.mxu0 %v3606_v55 }
 0x787   :  { %1789 = vmatpush.msrb.mxu0 %v3604_v24 }
 0x788   :  { %1790 = vmatmul.f32.vlgmr.msrb.gmra.mxu0 %v1767_v13 }
 0x805   :  { %v1791_v16 = vpop.f32.mrf.mxu0 }
 0x806   :  { %v1792_v63 = vadd.f32 %v1791_v16, %v1772_v59 }
 0x808   :  { %1795 = vst.msk [vmem:[%s3643_s12] sm:$0xf] %vm1794_vm5, %v1792_v63 }

</bundles_post_ra>
